<compile_context>
chip_gen: v7x
topology: tpu7x:2x2x1
jax: 0.10.0
libtpu: 0.0.40
codegen_flags: <defaults>
</compile_context>

<pallas_src>
import jax
import jax.numpy as jnp
import numpy as np
from jax.experimental import pallas as pl
from jax.experimental.pallas import tpu as pltpu

IN_CHANNELS = 1
OUTPUT_DIM = 10
PADDING = 2
K = 5

C1 = 6 * IN_CHANNELS              # conv1 out channels (6)
C2 = 16 * IN_CHANNELS             # conv2 out channels (16)
H_IN = 28                         # input spatial size
H1 = H_IN + 2 * PADDING - K + 1   # 28 (conv1 output)
P1 = H1 // 2                      # 14 (pool1 output)
H2 = P1 - K + 1                   # 10 (conv2 output)
P2 = H2 // 2                      # 5  (pool2 output)
FCK = P2 * P2 * C2                # 400 (flattened feature width)
NPAD = 128                        # lane-dense padded width for the FC stack / logits


# --------------------------------------------------------------------------- fused kernel
def _lenet5_kernel(x_ref, w1m_ref, b1_ref, p1h_ref, q1_ref,
                   w2m_ref, b2_ref, p2h_ref, q2_ref,
                   w3m_ref, b3_ref, w4_ref, b4_ref, w5_ref, b5_ref,
                   o_ref):
    f32, bf16 = jnp.float32, jnp.bfloat16
    tb = x_ref.shape[0]                                   # images per grid step (static)
    zrow = jnp.zeros((PADDING, H_IN), f32)                # hoisted zero rows for padding

    fc_rows = []
    for i in range(tb):
        # ----- conv1 + bias + tanh : single merged-tap banded matmul ------------------
        # Row padding via zero-row concat; column padding is baked into w1m host-side.
        x_rp = jnp.concatenate([zrow, x_ref[i], zrow], axis=0)                 # (32, 28)
        lhs1 = jnp.concatenate([x_rp[dy:dy + H1, :] for dy in range(K)],
                               axis=1).astype(bf16)                            # (28, 140)
        h1 = jnp.tanh(jnp.dot(lhs1, w1m_ref[...],
                              preferred_element_type=f32) + b1_ref[...])       # (28, 168)

        # ----- avgpool1 : two small matmuls (1/4 factor folded into q1) ---------------
        p1 = jnp.dot(p1h_ref[...],
                     jnp.dot(h1.astype(bf16), q1_ref[...],
                             preferred_element_type=f32).astype(bf16),
                     preferred_element_type=f32)                               # (14, 84)

        # ----- conv2 + bias + tanh : single merged-tap banded matmul ------------------
        lhs2 = jnp.concatenate([p1[dy:dy + H2, :] for dy in range(K)],
                               axis=1).astype(bf16)                            # (10, 420)
        h2 = jnp.tanh(jnp.dot(lhs2, w2m_ref[...],
                              preferred_element_type=f32) + b2_ref[...])       # (10, 160)

        # ----- avgpool2 ----------------------------------------------------------------
        p2 = jnp.dot(p2h_ref[...],
                     jnp.dot(h2.astype(bf16), q2_ref[...],
                             preferred_element_type=f32).astype(bf16),
                     preferred_element_type=f32)                               # (5, 80)

        # Stage this image's features as one (1, 400) row for the batched FC stage.
        fc_rows.append(jnp.concatenate([p2[r:r + 1, :] for r in range(P2)], axis=1))

    # ----- batched FC stack (M = tb) ----------------------------------------------------
    fc_in = jnp.concatenate(fc_rows, axis=0).astype(bf16)                      # (tb, 400)
    # fc1 : the PyTorch NCHW flatten permutation is already folded into w3m host-side.
    y = jnp.tanh(jnp.dot(fc_in, w3m_ref[...],
                         preferred_element_type=f32) + b3_ref[...])            # (tb, 128)
    # TODO(synk): Dropout(p=0.2) is identity here (inference semantics); no RNG masking.
    y = jnp.tanh(jnp.dot(y.astype(bf16), w4_ref[...],
                         preferred_element_type=f32) + b4_ref[...])            # (tb, 128)
    # fc3 (logits live in lanes [:OUTPUT_DIM]; remaining lanes are zero padding)
    y = jnp.dot(y.astype(bf16), w5_ref[...],
                preferred_element_type=f32) + b5_ref[...]                      # (tb, 128)

    o_ref[...] = y


# --------------------------------------------------------------------------- host-side packing
def _merged_band(w, in_width, out_width, pad):
    """w: (kh, kw, Cin, Cout) -> (kh*in_width*Cin, out_width*Cout) merged banded weights.

    With LHS[oy, (dy*in_width + c)*Cin + ci] = x_rowpadded[oy+dy, c*Cin + ci] (concat of the
    kh shifted row-windows along the K axis), a full kh x kw conv (column padding included)
    is ONE matmul  LHS @ band.
    """
    kh, kw, cin, cout = w.shape
    band = np.zeros((kh * in_width * cin, out_width * cout), np.float32)
    for dy in range(kh):
        for dx in range(kw):
            for j in range(out_width):            # output column
                src = j + dx - pad                # input column (column padding baked here)
                if 0 <= src < in_width:
                    r0 = (dy * in_width + src) * cin
                    band[r0:r0 + cin, j * cout:(j + 1) * cout] = w[dy, dx]
    return band


def _pool_matrices(h, w, c):
    """AvgPool2d(2,2) as left/right matmuls on the (h, w*c) channel-interleaved slab."""
    ph = np.zeros((h // 2, h), np.float32)
    for m in range(h // 2):
        ph[m, 2 * m] = 1.0
        ph[m, 2 * m + 1] = 1.0
    qw = np.zeros((w * c, (w // 2) * c), np.float32)
    for j in range(w):
        for cc in range(c):
            qw[j * c + cc, (j // 2) * c + cc] = 0.25      # fold the 2x2 mean factor here
    return ph, qw


def _pack_fc1(w3, b3):
    """Fold the PyTorch NCHW flatten order (c*25 + r*5 + j) into a single (400, 128) fc1
    weight matching the in-kernel staging order col = r*80 + j*16 + c; pad N to 128."""
    w3p = np.zeros((FCK, NPAD), np.float32)
    w3p[:, :w3.shape[1]] = w3
    w3m = np.zeros((FCK, NPAD), np.float32)
    for r in range(P2):
        for j in range(P2):
            for c in range(C2):
                w3m[r * (P2 * C2) + j * C2 + c, :] = w3p[c * P2 * P2 + r * P2 + j, :]
    b3r = np.zeros((1, NPAD), np.float32)
    b3r[0, :b3.shape[0]] = b3
    return w3m, b3r


def _pad_fc(w, b, rows, cols):
    wp = np.zeros((rows, cols), np.float32)
    wp[:w.shape[0], :w.shape[1]] = w
    bp = np.zeros((1, cols), np.float32)
    bp[0, :b.shape[0]] = b
    return wp, bp


def init_raw_params(key):
    """Deterministic synthetic parameters with the module's shapes (in_channels=1)."""
    ks = jax.random.split(key, 10)

    def _w(k, shape, fan_in):
        return jax.random.normal(k, shape, jnp.float32) / np.sqrt(float(fan_in))

    return {
        "w1": _w(ks[0], (K, K, IN_CHANNELS, C1), K * K * IN_CHANNELS),
        "b1": _w(ks[1], (C1,), K * K * IN_CHANNELS),
        "w2": _w(ks[2], (K, K, C1, C2), K * K * C1),
        "b2": _w(ks[3], (C2,), K * K * C1),
        "w3": _w(ks[4], (FCK, 120), FCK),
        "b3": _w(ks[5], (120,), FCK),
        "w4": _w(ks[6], (120, 84), 120),
        "b4": _w(ks[7], (84,), 120),
        "w5": _w(ks[8], (84, OUTPUT_DIM), 84),
        "b5": _w(ks[9], (OUTPUT_DIM,), 84),
    }


def pack_params(raw):
    w1 = np.asarray(raw["w1"]); b1 = np.asarray(raw["b1"])
    w2 = np.asarray(raw["w2"]); b2 = np.asarray(raw["b2"])
    w3 = np.asarray(raw["w3"]); b3 = np.asarray(raw["b3"])
    w4 = np.asarray(raw["w4"]); b4 = np.asarray(raw["b4"])
    w5 = np.asarray(raw["w5"]); b5 = np.asarray(raw["b5"])

    w1m = _merged_band(w1, H_IN, H1, PADDING)             # (140, 168)
    b1r = np.tile(b1, H1).reshape(1, H1 * C1)             # (1, 168)
    p1h, q1 = _pool_matrices(H1, H1, C1)                  # (14, 28), (168, 84)
    w2m = _merged_band(w2, P1, H2, 0)                     # (420, 160)
    b2r = np.tile(b2, H2).reshape(1, H2 * C2)             # (1, 160)
    p2h, q2 = _pool_matrices(H2, H2, C2)                  # (5, 10), (160, 80)
    w3m, b3r = _pack_fc1(w3, b3)                          # (400, 128), (1, 128)
    w4p, b4p = _pad_fc(w4, b4, NPAD, NPAD)                # (128, 128), (1, 128)
    w5p, b5p = _pad_fc(w5, b5, NPAD, NPAD)                # (128, 128), (1, 128)

    bf = lambda a: jnp.asarray(a, jnp.bfloat16)           # matmul weights -> bf16 (MXU native)
    f32 = lambda a: jnp.asarray(a, jnp.float32)           # biases stay f32 (added post-dot)
    return (bf(w1m), f32(b1r), bf(p1h), bf(q1),
            bf(w2m), f32(b2r), bf(p2h), bf(q2),
            bf(w3m), f32(b3r), bf(w4p), f32(b4p), bf(w5p), f32(b5p))


def _pick_tb(batch):
    """Images per grid step. Block second-to-last dim must be the full batch or 8-aligned."""
    if batch <= 8:
        return batch
    for tb in (128, 64, 32, 16, 8):
        if batch % tb == 0:
            return tb
    return batch


# --------------------------------------------------------------------------- forward
@jax.jit
def lenet5_forward(x_nchw, packed):
    B = x_nchw.shape[0]
    TB = _pick_tb(B)
    x = x_nchw.astype(jnp.float32)[:, 0, :, :]            # (B, 28, 28) — no wrapper padding
    (w1m, b1r, p1h, q1, w2m, b2r, p2h, q2, w3m, b3r, w4p, b4p, w5p, b5p) = packed

    full = lambda b: (0, 0)
    out = pl.pallas_call(
        _lenet5_kernel,
        out_shape=jax.ShapeDtypeStruct((B, NPAD), jnp.float32),
        grid=(B // TB,),
        in_specs=[
            pl.BlockSpec((TB, H_IN, H_IN), lambda b: (b, 0, 0)),                # x block
            pl.BlockSpec(w1m.shape, full), pl.BlockSpec(b1r.shape, full),
            pl.BlockSpec(p1h.shape, full), pl.BlockSpec(q1.shape, full),
            pl.BlockSpec(w2m.shape, full), pl.BlockSpec(b2r.shape, full),
            pl.BlockSpec(p2h.shape, full), pl.BlockSpec(q2.shape, full),
            pl.BlockSpec(w3m.shape, full), pl.BlockSpec(b3r.shape, full),
            pl.BlockSpec(w4p.shape, full), pl.BlockSpec(b4p.shape, full),
            pl.BlockSpec(w5p.shape, full), pl.BlockSpec(b5p.shape, full),
        ],
        out_specs=pl.BlockSpec((TB, NPAD), lambda b: (b, 0)),                   # lane-dense
        compiler_params=pltpu.CompilerParams(dimension_semantics=("parallel",)),
    )(x, w1m, b1r, p1h, q1, w2m, b2r, p2h, q2, w3m, b3r, w4p, b4p, w5p, b5p)

    return out[:, :OUTPUT_DIM]                                                  # (B, 10)


# --------------------------------------------------------------------------- pure-JAX reference
def _avgpool_ref(x):
    B, H, W, C = x.shape
    return x.reshape(B, H // 2, 2, W // 2, 2, C).mean(axis=(2, 4))


def lenet5_reference(x_nchw, raw):
    x = jnp.transpose(x_nchw.astype(jnp.float32), (0, 2, 3, 1))                 # NHWC
    h = jax.lax.conv_general_dilated(
        x, raw["w1"], window_strides=(1, 1),
        padding=((PADDING, PADDING), (PADDING, PADDING)),
        dimension_numbers=("NHWC", "HWIO", "NHWC"))
    h = jnp.tanh(h + raw["b1"])
    h = _avgpool_ref(h)
    h = jax.lax.conv_general_dilated(
        h, raw["w2"], window_strides=(1, 1), padding="VALID",
        dimension_numbers=("NHWC", "HWIO", "NHWC"))
    h = jnp.tanh(h + raw["b2"])
    h = _avgpool_ref(h)
    h = jnp.transpose(h, (0, 3, 1, 2)).reshape(h.shape[0], -1)                  # NCHW flatten
    h = jnp.tanh(h @ raw["w3"] + raw["b3"])
    h = jnp.tanh(h @ raw["w4"] + raw["b4"])
    return h @ raw["w5"] + raw["b5"]


# --------------------------------------------------------------------------- main
if __name__ == "__main__":
    key = jax.random.PRNGKey(0)
    k_x, k_p = jax.random.split(key)
    x = jax.random.normal(k_x, (2, IN_CHANNELS, 28, 28), jnp.float32)   # NCHW like PyTorch
    raw = init_raw_params(k_p)
    packed = pack_params(raw)

    out = lenet5_forward(x, packed)
    out = jax.block_until_ready(out)
    assert out.shape == (2, OUTPUT_DIM), out.shape
    assert bool(jnp.all(jnp.isfinite(out)))

    with jax.default_matmul_precision("highest"):
        ref = lenet5_reference(x, raw)
    err = float(jnp.max(jnp.abs(out - ref)))
    assert err < 5e-2, f"max abs err vs reference = {err}"

    print("KERNEL_OK")
</pallas_src>

<mosaic_0001>
module attributes {stable_mosaic.version = 11 : i64} {
  func.func @_lenet5_kernel(%arg0: i32, %arg1: memref<2x28x28xf32, #tpu.memory_space<vmem>>, %arg2: memref<140x168xbf16, #tpu.memory_space<vmem>>, %arg3: memref<1x168xf32, #tpu.memory_space<vmem>>, %arg4: memref<14x28xbf16, #tpu.memory_space<vmem>>, %arg5: memref<168x84xbf16, #tpu.memory_space<vmem>>, %arg6: memref<420x160xbf16, #tpu.memory_space<vmem>>, %arg7: memref<1x160xf32, #tpu.memory_space<vmem>>, %arg8: memref<5x10xbf16, #tpu.memory_space<vmem>>, %arg9: memref<160x80xbf16, #tpu.memory_space<vmem>>, %arg10: memref<400x128xbf16, #tpu.memory_space<vmem>>, %arg11: memref<1x128xf32, #tpu.memory_space<vmem>>, %arg12: memref<128x128xbf16, #tpu.memory_space<vmem>>, %arg13: memref<1x128xf32, #tpu.memory_space<vmem>>, %arg14: memref<128x128xbf16, #tpu.memory_space<vmem>>, %arg15: memref<1x128xf32, #tpu.memory_space<vmem>>, %arg16: memref<2x128xf32, #tpu.memory_space<vmem>>) attributes {dimension_semantics = [#tpu.dimension_semantics<parallel>], iteration_bounds = array<i64: 1>, scalar_prefetch = 0 : i64, scratch_operands = 0 : i64, tpu.core_type = #tpu.core_type<tc>, window_params = [{transform_indices = @transform_0, window_bounds = array<i64: 2, 28, 28>}, {pipeline_mode = #tpu.pipeline_mode<synchronous>, transform_indices = @transform_1, window_bounds = array<i64: 140, 168>}, {pipeline_mode = #tpu.pipeline_mode<synchronous>, transform_indices = @transform_2, window_bounds = array<i64: 1, 168>}, {pipeline_mode = #tpu.pipeline_mode<synchronous>, transform_indices = @transform_3, window_bounds = array<i64: 14, 28>}, {pipeline_mode = #tpu.pipeline_mode<synchronous>, transform_indices = @transform_4, window_bounds = array<i64: 168, 84>}, {pipeline_mode = #tpu.pipeline_mode<synchronous>, transform_indices = @transform_5, window_bounds = array<i64: 420, 160>}, {pipeline_mode = #tpu.pipeline_mode<synchronous>, transform_indices = @transform_6, window_bounds = array<i64: 1, 160>}, {pipeline_mode = #tpu.pipeline_mode<synchronous>, transform_indices = @transform_7, window_bounds = array<i64: 5, 10>}, {pipeline_mode = #tpu.pipeline_mode<synchronous>, transform_indices = @transform_8, window_bounds = array<i64: 160, 80>}, {pipeline_mode = #tpu.pipeline_mode<synchronous>, transform_indices = @transform_9, window_bounds = array<i64: 400, 128>}, {pipeline_mode = #tpu.pipeline_mode<synchronous>, transform_indices = @transform_10, window_bounds = array<i64: 1, 128>}, {pipeline_mode = #tpu.pipeline_mode<synchronous>, transform_indices = @transform_11, window_bounds = array<i64: 128, 128>}, {pipeline_mode = #tpu.pipeline_mode<synchronous>, transform_indices = @transform_12, window_bounds = array<i64: 1, 128>}, {pipeline_mode = #tpu.pipeline_mode<synchronous>, transform_indices = @transform_13, window_bounds = array<i64: 128, 128>}, {pipeline_mode = #tpu.pipeline_mode<synchronous>, transform_indices = @transform_14, window_bounds = array<i64: 1, 128>}, {transform_indices = @transform_15, window_bounds = array<i64: 2, 128>}]} {
    %cst = arith.constant 0.000000e+00 : f32
    %0 = vector.broadcast %cst : f32 to vector<2x28xf32>
    %c0 = arith.constant 0 : index
    %c0_0 = arith.constant 0 : index
    %c0_1 = arith.constant 0 : index
    %1 = vector.load %arg1[%c0, %c0_0, %c0_1] : memref<2x28x28xf32, #tpu.memory_space<vmem>>, vector<1x28x28xf32>
    %2 = vector.shape_cast %1 : vector<1x28x28xf32> to vector<28x28xf32>
    %3 = tpu.concatenate %0, %2, %0 in 0 : vector<2x28xf32>, vector<28x28xf32>, vector<2x28xf32> -> vector<32x28xf32>
    %4 = vector.extract_strided_slice %3 {offsets = [0, 0], sizes = [28, 28], strides = [1, 1]} : vector<32x28xf32> to vector<28x28xf32>
    %5 = vector.extract_strided_slice %3 {offsets = [1, 0], sizes = [28, 28], strides = [1, 1]} : vector<32x28xf32> to vector<28x28xf32>
    %6 = vector.extract_strided_slice %3 {offsets = [2, 0], sizes = [28, 28], strides = [1, 1]} : vector<32x28xf32> to vector<28x28xf32>
    %7 = vector.extract_strided_slice %3 {offsets = [3, 0], sizes = [28, 28], strides = [1, 1]} : vector<32x28xf32> to vector<28x28xf32>
    %8 = vector.extract_strided_slice %3 {offsets = [4, 0], sizes = [28, 28], strides = [1, 1]} : vector<32x28xf32> to vector<28x28xf32>
    %9 = tpu.concatenate %4, %5, %6, %7, %8 in 1 : vector<28x28xf32>, vector<28x28xf32>, vector<28x28xf32>, vector<28x28xf32>, vector<28x28xf32> -> vector<28x140xf32>
    %10 = arith.truncf %9 : vector<28x140xf32> to vector<28x140xbf16>
    %c0_2 = arith.constant 0 : index
    %c0_3 = arith.constant 0 : index
    %11 = vector.load %arg2[%c0_2, %c0_3] : memref<140x168xbf16, #tpu.memory_space<vmem>>, vector<140x168xbf16>
    %cst_4 = arith.constant dense<0.000000e+00> : vector<28x168xf32>
    %12 = tpu.matmul %10, %11, %cst_4 {dimension_numbers = #tpu.dot_dimension_numbers<[1], [0], [0], [1], [0, 0, 1, 1], [], []>} : vector<28x140xbf16>, vector<140x168xbf16>, vector<28x168xf32> -> vector<28x168xf32>
    %c0_5 = arith.constant 0 : index
    %c0_6 = arith.constant 0 : index
    %13 = vector.load %arg3[%c0_5, %c0_6] : memref<1x168xf32, #tpu.memory_space<vmem>>, vector<1x168xf32>
    %14 = vector.broadcast %13 : vector<1x168xf32> to vector<28x168xf32>
    %15 = arith.addf %12, %14 : vector<28x168xf32>
    %16 = math.tanh %15 : vector<28x168xf32>
    %c0_7 = arith.constant 0 : index
    %c0_8 = arith.constant 0 : index
    %17 = vector.load %arg4[%c0_7, %c0_8] : memref<14x28xbf16, #tpu.memory_space<vmem>>, vector<14x28xbf16>
    %18 = arith.truncf %16 : vector<28x168xf32> to vector<28x168xbf16>
    %c0_9 = arith.constant 0 : index
    %c0_10 = arith.constant 0 : index
    %19 = vector.load %arg5[%c0_9, %c0_10] : memref<168x84xbf16, #tpu.memory_space<vmem>>, vector<168x84xbf16>
    %cst_11 = arith.constant dense<0.000000e+00> : vector<28x84xf32>
    %20 = tpu.matmul %18, %19, %cst_11 {dimension_numbers = #tpu.dot_dimension_numbers<[1], [0], [0], [1], [0, 0, 1, 1], [], []>} : vector<28x168xbf16>, vector<168x84xbf16>, vector<28x84xf32> -> vector<28x84xf32>
    %21 = arith.truncf %20 : vector<28x84xf32> to vector<28x84xbf16>
    %cst_12 = arith.constant dense<0.000000e+00> : vector<14x84xf32>
    %22 = tpu.matmul %17, %21, %cst_12 {dimension_numbers = #tpu.dot_dimension_numbers<[1], [0], [0], [1], [0, 0, 1, 1], [], []>} : vector<14x28xbf16>, vector<28x84xbf16>, vector<14x84xf32> -> vector<14x84xf32>
    %23 = vector.extract_strided_slice %22 {offsets = [0, 0], sizes = [10, 84], strides = [1, 1]} : vector<14x84xf32> to vector<10x84xf32>
    %24 = vector.extract_strided_slice %22 {offsets = [1, 0], sizes = [10, 84], strides = [1, 1]} : vector<14x84xf32> to vector<10x84xf32>
    %25 = vector.extract_strided_slice %22 {offsets = [2, 0], sizes = [10, 84], strides = [1, 1]} : vector<14x84xf32> to vector<10x84xf32>
    %26 = vector.extract_strided_slice %22 {offsets = [3, 0], sizes = [10, 84], strides = [1, 1]} : vector<14x84xf32> to vector<10x84xf32>
    %27 = vector.extract_strided_slice %22 {offsets = [4, 0], sizes = [10, 84], strides = [1, 1]} : vector<14x84xf32> to vector<10x84xf32>
    %28 = tpu.concatenate %23, %24, %25, %26, %27 in 1 : vector<10x84xf32>, vector<10x84xf32>, vector<10x84xf32>, vector<10x84xf32>, vector<10x84xf32> -> vector<10x420xf32>
    %29 = arith.truncf %28 : vector<10x420xf32> to vector<10x420xbf16>
    %c0_13 = arith.constant 0 : index
    %c0_14 = arith.constant 0 : index
    %30 = vector.load %arg6[%c0_13, %c0_14] : memref<420x160xbf16, #tpu.memory_space<vmem>>, vector<420x160xbf16>
    %cst_15 = arith.constant dense<0.000000e+00> : vector<10x160xf32>
    %31 = tpu.matmul %29, %30, %cst_15 {dimension_numbers = #tpu.dot_dimension_numbers<[1], [0], [0], [1], [0, 0, 1, 1], [], []>} : vector<10x420xbf16>, vector<420x160xbf16>, vector<10x160xf32> -> vector<10x160xf32>
    %c0_16 = arith.constant 0 : index
    %c0_17 = arith.constant 0 : index
    %32 = vector.load %arg7[%c0_16, %c0_17] : memref<1x160xf32, #tpu.memory_space<vmem>>, vector<1x160xf32>
    %33 = vector.broadcast %32 : vector<1x160xf32> to vector<10x160xf32>
    %34 = arith.addf %31, %33 : vector<10x160xf32>
    %35 = math.tanh %34 : vector<10x160xf32>
    %c0_18 = arith.constant 0 : index
    %c0_19 = arith.constant 0 : index
    %36 = vector.load %arg8[%c0_18, %c0_19] : memref<5x10xbf16, #tpu.memory_space<vmem>>, vector<5x10xbf16>
    %37 = arith.truncf %35 : vector<10x160xf32> to vector<10x160xbf16>
    %c0_20 = arith.constant 0 : index
    %c0_21 = arith.constant 0 : index
    %38 = vector.load %arg9[%c0_20, %c0_21] : memref<160x80xbf16, #tpu.memory_space<vmem>>, vector<160x80xbf16>
    %cst_22 = arith.constant dense<0.000000e+00> : vector<10x80xf32>
    %39 = tpu.matmul %37, %38, %cst_22 {dimension_numbers = #tpu.dot_dimension_numbers<[1], [0], [0], [1], [0, 0, 1, 1], [], []>} : vector<10x160xbf16>, vector<160x80xbf16>, vector<10x80xf32> -> vector<10x80xf32>
    %40 = arith.truncf %39 : vector<10x80xf32> to vector<10x80xbf16>
    %cst_23 = arith.constant dense<0.000000e+00> : vector<5x80xf32>
    %41 = tpu.matmul %36, %40, %cst_23 {dimension_numbers = #tpu.dot_dimension_numbers<[1], [0], [0], [1], [0, 0, 1, 1], [], []>} : vector<5x10xbf16>, vector<10x80xbf16>, vector<5x80xf32> -> vector<5x80xf32>
    %42 = vector.extract_strided_slice %41 {offsets = [0, 0], sizes = [1, 80], strides = [1, 1]} : vector<5x80xf32> to vector<1x80xf32>
    %43 = vector.extract_strided_slice %41 {offsets = [1, 0], sizes = [1, 80], strides = [1, 1]} : vector<5x80xf32> to vector<1x80xf32>
    %44 = vector.extract_strided_slice %41 {offsets = [2, 0], sizes = [1, 80], strides = [1, 1]} : vector<5x80xf32> to vector<1x80xf32>
    %45 = vector.extract_strided_slice %41 {offsets = [3, 0], sizes = [1, 80], strides = [1, 1]} : vector<5x80xf32> to vector<1x80xf32>
    %46 = vector.extract_strided_slice %41 {offsets = [4, 0], sizes = [1, 80], strides = [1, 1]} : vector<5x80xf32> to vector<1x80xf32>
    %47 = tpu.concatenate %42, %43, %44, %45, %46 in 1 : vector<1x80xf32>, vector<1x80xf32>, vector<1x80xf32>, vector<1x80xf32>, vector<1x80xf32> -> vector<1x400xf32>
    %c1 = arith.constant 1 : index
    %c0_24 = arith.constant 0 : index
    %c0_25 = arith.constant 0 : index
    %48 = vector.load %arg1[%c1, %c0_24, %c0_25] : memref<2x28x28xf32, #tpu.memory_space<vmem>>, vector<1x28x28xf32>
    %49 = vector.shape_cast %48 : vector<1x28x28xf32> to vector<28x28xf32>
    %50 = tpu.concatenate %0, %49, %0 in 0 : vector<2x28xf32>, vector<28x28xf32>, vector<2x28xf32> -> vector<32x28xf32>
    %51 = vector.extract_strided_slice %50 {offsets = [0, 0], sizes = [28, 28], strides = [1, 1]} : vector<32x28xf32> to vector<28x28xf32>
    %52 = vector.extract_strided_slice %50 {offsets = [1, 0], sizes = [28, 28], strides = [1, 1]} : vector<32x28xf32> to vector<28x28xf32>
    %53 = vector.extract_strided_slice %50 {offsets = [2, 0], sizes = [28, 28], strides = [1, 1]} : vector<32x28xf32> to vector<28x28xf32>
    %54 = vector.extract_strided_slice %50 {offsets = [3, 0], sizes = [28, 28], strides = [1, 1]} : vector<32x28xf32> to vector<28x28xf32>
    %55 = vector.extract_strided_slice %50 {offsets = [4, 0], sizes = [28, 28], strides = [1, 1]} : vector<32x28xf32> to vector<28x28xf32>
    %56 = tpu.concatenate %51, %52, %53, %54, %55 in 1 : vector<28x28xf32>, vector<28x28xf32>, vector<28x28xf32>, vector<28x28xf32>, vector<28x28xf32> -> vector<28x140xf32>
    %57 = arith.truncf %56 : vector<28x140xf32> to vector<28x140xbf16>
    %c0_26 = arith.constant 0 : index
    %c0_27 = arith.constant 0 : index
    %58 = vector.load %arg2[%c0_26, %c0_27] : memref<140x168xbf16, #tpu.memory_space<vmem>>, vector<140x168xbf16>
    %cst_28 = arith.constant dense<0.000000e+00> : vector<28x168xf32>
    %59 = tpu.matmul %57, %58, %cst_28 {dimension_numbers = #tpu.dot_dimension_numbers<[1], [0], [0], [1], [0, 0, 1, 1], [], []>} : vector<28x140xbf16>, vector<140x168xbf16>, vector<28x168xf32> -> vector<28x168xf32>
    %c0_29 = arith.constant 0 : index
    %c0_30 = arith.constant 0 : index
    %60 = vector.load %arg3[%c0_29, %c0_30] : memref<1x168xf32, #tpu.memory_space<vmem>>, vector<1x168xf32>
    %61 = vector.broadcast %60 : vector<1x168xf32> to vector<28x168xf32>
    %62 = arith.addf %59, %61 : vector<28x168xf32>
    %63 = math.tanh %62 : vector<28x168xf32>
    %c0_31 = arith.constant 0 : index
    %c0_32 = arith.constant 0 : index
    %64 = vector.load %arg4[%c0_31, %c0_32] : memref<14x28xbf16, #tpu.memory_space<vmem>>, vector<14x28xbf16>
    %65 = arith.truncf %63 : vector<28x168xf32> to vector<28x168xbf16>
    %c0_33 = arith.constant 0 : index
    %c0_34 = arith.constant 0 : index
    %66 = vector.load %arg5[%c0_33, %c0_34] : memref<168x84xbf16, #tpu.memory_space<vmem>>, vector<168x84xbf16>
    %cst_35 = arith.constant dense<0.000000e+00> : vector<28x84xf32>
    %67 = tpu.matmul %65, %66, %cst_35 {dimension_numbers = #tpu.dot_dimension_numbers<[1], [0], [0], [1], [0, 0, 1, 1], [], []>} : vector<28x168xbf16>, vector<168x84xbf16>, vector<28x84xf32> -> vector<28x84xf32>
    %68 = arith.truncf %67 : vector<28x84xf32> to vector<28x84xbf16>
    %cst_36 = arith.constant dense<0.000000e+00> : vector<14x84xf32>
    %69 = tpu.matmul %64, %68, %cst_36 {dimension_numbers = #tpu.dot_dimension_numbers<[1], [0], [0], [1], [0, 0, 1, 1], [], []>} : vector<14x28xbf16>, vector<28x84xbf16>, vector<14x84xf32> -> vector<14x84xf32>
    %70 = vector.extract_strided_slice %69 {offsets = [0, 0], sizes = [10, 84], strides = [1, 1]} : vector<14x84xf32> to vector<10x84xf32>
    %71 = vector.extract_strided_slice %69 {offsets = [1, 0], sizes = [10, 84], strides = [1, 1]} : vector<14x84xf32> to vector<10x84xf32>
    %72 = vector.extract_strided_slice %69 {offsets = [2, 0], sizes = [10, 84], strides = [1, 1]} : vector<14x84xf32> to vector<10x84xf32>
    %73 = vector.extract_strided_slice %69 {offsets = [3, 0], sizes = [10, 84], strides = [1, 1]} : vector<14x84xf32> to vector<10x84xf32>
    %74 = vector.extract_strided_slice %69 {offsets = [4, 0], sizes = [10, 84], strides = [1, 1]} : vector<14x84xf32> to vector<10x84xf32>
    %75 = tpu.concatenate %70, %71, %72, %73, %74 in 1 : vector<10x84xf32>, vector<10x84xf32>, vector<10x84xf32>, vector<10x84xf32>, vector<10x84xf32> -> vector<10x420xf32>
    %76 = arith.truncf %75 : vector<10x420xf32> to vector<10x420xbf16>
    %c0_37 = arith.constant 0 : index
    %c0_38 = arith.constant 0 : index
    %77 = vector.load %arg6[%c0_37, %c0_38] : memref<420x160xbf16, #tpu.memory_space<vmem>>, vector<420x160xbf16>
    %cst_39 = arith.constant dense<0.000000e+00> : vector<10x160xf32>
    %78 = tpu.matmul %76, %77, %cst_39 {dimension_numbers = #tpu.dot_dimension_numbers<[1], [0], [0], [1], [0, 0, 1, 1], [], []>} : vector<10x420xbf16>, vector<420x160xbf16>, vector<10x160xf32> -> vector<10x160xf32>
    %c0_40 = arith.constant 0 : index
    %c0_41 = arith.constant 0 : index
    %79 = vector.load %arg7[%c0_40, %c0_41] : memref<1x160xf32, #tpu.memory_space<vmem>>, vector<1x160xf32>
    %80 = vector.broadcast %79 : vector<1x160xf32> to vector<10x160xf32>
    %81 = arith.addf %78, %80 : vector<10x160xf32>
    %82 = math.tanh %81 : vector<10x160xf32>
    %c0_42 = arith.constant 0 : index
    %c0_43 = arith.constant 0 : index
    %83 = vector.load %arg8[%c0_42, %c0_43] : memref<5x10xbf16, #tpu.memory_space<vmem>>, vector<5x10xbf16>
    %84 = arith.truncf %82 : vector<10x160xf32> to vector<10x160xbf16>
    %c0_44 = arith.constant 0 : index
    %c0_45 = arith.constant 0 : index
    %85 = vector.load %arg9[%c0_44, %c0_45] : memref<160x80xbf16, #tpu.memory_space<vmem>>, vector<160x80xbf16>
    %cst_46 = arith.constant dense<0.000000e+00> : vector<10x80xf32>
    %86 = tpu.matmul %84, %85, %cst_46 {dimension_numbers = #tpu.dot_dimension_numbers<[1], [0], [0], [1], [0, 0, 1, 1], [], []>} : vector<10x160xbf16>, vector<160x80xbf16>, vector<10x80xf32> -> vector<10x80xf32>
    %87 = arith.truncf %86 : vector<10x80xf32> to vector<10x80xbf16>
    %cst_47 = arith.constant dense<0.000000e+00> : vector<5x80xf32>
    %88 = tpu.matmul %83, %87, %cst_47 {dimension_numbers = #tpu.dot_dimension_numbers<[1], [0], [0], [1], [0, 0, 1, 1], [], []>} : vector<5x10xbf16>, vector<10x80xbf16>, vector<5x80xf32> -> vector<5x80xf32>
    %89 = vector.extract_strided_slice %88 {offsets = [0, 0], sizes = [1, 80], strides = [1, 1]} : vector<5x80xf32> to vector<1x80xf32>
    %90 = vector.extract_strided_slice %88 {offsets = [1, 0], sizes = [1, 80], strides = [1, 1]} : vector<5x80xf32> to vector<1x80xf32>
    %91 = vector.extract_strided_slice %88 {offsets = [2, 0], sizes = [1, 80], strides = [1, 1]} : vector<5x80xf32> to vector<1x80xf32>
    %92 = vector.extract_strided_slice %88 {offsets = [3, 0], sizes = [1, 80], strides = [1, 1]} : vector<5x80xf32> to vector<1x80xf32>
    %93 = vector.extract_strided_slice %88 {offsets = [4, 0], sizes = [1, 80], strides = [1, 1]} : vector<5x80xf32> to vector<1x80xf32>
    %94 = tpu.concatenate %89, %90, %91, %92, %93 in 1 : vector<1x80xf32>, vector<1x80xf32>, vector<1x80xf32>, vector<1x80xf32>, vector<1x80xf32> -> vector<1x400xf32>
    %95 = tpu.concatenate %47, %94 in 0 : vector<1x400xf32>, vector<1x400xf32> -> vector<2x400xf32>
    %96 = arith.truncf %95 : vector<2x400xf32> to vector<2x400xbf16>
    %c0_48 = arith.constant 0 : index
    %c0_49 = arith.constant 0 : index
    %97 = vector.load %arg10[%c0_48, %c0_49] : memref<400x128xbf16, #tpu.memory_space<vmem>>, vector<400x128xbf16>
    %cst_50 = arith.constant dense<0.000000e+00> : vector<2x128xf32>
    %98 = tpu.matmul %96, %97, %cst_50 {dimension_numbers = #tpu.dot_dimension_numbers<[1], [0], [0], [1], [0, 0, 1, 1], [], []>} : vector<2x400xbf16>, vector<400x128xbf16>, vector<2x128xf32> -> vector<2x128xf32>
    %c0_51 = arith.constant 0 : index
    %c0_52 = arith.constant 0 : index
    %99 = vector.load %arg11[%c0_51, %c0_52] : memref<1x128xf32, #tpu.memory_space<vmem>>, vector<1x128xf32>
    %100 = vector.broadcast %99 : vector<1x128xf32> to vector<2x128xf32>
    %101 = arith.addf %98, %100 : vector<2x128xf32>
    %102 = math.tanh %101 : vector<2x128xf32>
    %103 = arith.truncf %102 : vector<2x128xf32> to vector<2x128xbf16>
    %c0_53 = arith.constant 0 : index
    %c0_54 = arith.constant 0 : index
    %104 = vector.load %arg12[%c0_53, %c0_54] : memref<128x128xbf16, #tpu.memory_space<vmem>>, vector<128x128xbf16>
    %cst_55 = arith.constant dense<0.000000e+00> : vector<2x128xf32>
    %105 = tpu.matmul %103, %104, %cst_55 {dimension_numbers = #tpu.dot_dimension_numbers<[1], [0], [0], [1], [0, 0, 1, 1], [], []>} : vector<2x128xbf16>, vector<128x128xbf16>, vector<2x128xf32> -> vector<2x128xf32>
    %c0_56 = arith.constant 0 : index
    %c0_57 = arith.constant 0 : index
    %106 = vector.load %arg13[%c0_56, %c0_57] : memref<1x128xf32, #tpu.memory_space<vmem>>, vector<1x128xf32>
    %107 = vector.broadcast %106 : vector<1x128xf32> to vector<2x128xf32>
    %108 = arith.addf %105, %107 : vector<2x128xf32>
    %109 = math.tanh %108 : vector<2x128xf32>
    %110 = arith.truncf %109 : vector<2x128xf32> to vector<2x128xbf16>
    %c0_58 = arith.constant 0 : index
    %c0_59 = arith.constant 0 : index
    %111 = vector.load %arg14[%c0_58, %c0_59] : memref<128x128xbf16, #tpu.memory_space<vmem>>, vector<128x128xbf16>
    %cst_60 = arith.constant dense<0.000000e+00> : vector<2x128xf32>
    %112 = tpu.matmul %110, %111, %cst_60 {dimension_numbers = #tpu.dot_dimension_numbers<[1], [0], [0], [1], [0, 0, 1, 1], [], []>} : vector<2x128xbf16>, vector<128x128xbf16>, vector<2x128xf32> -> vector<2x128xf32>
    %c0_61 = arith.constant 0 : index
    %c0_62 = arith.constant 0 : index
    %113 = vector.load %arg15[%c0_61, %c0_62] : memref<1x128xf32, #tpu.memory_space<vmem>>, vector<1x128xf32>
    %114 = vector.broadcast %113 : vector<1x128xf32> to vector<2x128xf32>
    %115 = arith.addf %112, %114 : vector<2x128xf32>
    %c0_63 = arith.constant 0 : index
    %c0_64 = arith.constant 0 : index
    %116 = vector.load %arg16[%c0_63, %c0_64] : memref<2x128xf32, #tpu.memory_space<vmem>>, vector<2x128xf32>
    tpu.vector_store %arg16[%c0_63, %c0_64], %115 {strides = array<i32>} : memref<2x128xf32, #tpu.memory_space<vmem>>, vector<2x128xf32>,
    return
  }
  func.func @transform_0(%arg0: i32) -> (i32, i32, i32) {
    %c0_i32 = arith.constant 0 : i32
    %c0_i32_0 = arith.constant 0 : i32
    %c0_i32_1 = arith.constant 0 : i32
    return %arg0, %c0_i32, %c0_i32_0 : i32, i32, i32
  }
  func.func @transform_1(%arg0: i32) -> (i32, i32) {
    %c0_i32 = arith.constant 0 : i32
    %c0_i32_0 = arith.constant 0 : i32
    %c0_i32_1 = arith.constant 0 : i32
    return %c0_i32, %c0_i32_0 : i32, i32
  }
  func.func @transform_2(%arg0: i32) -> (i32, i32) {
    %c0_i32 = arith.constant 0 : i32
    %c0_i32_0 = arith.constant 0 : i32
    %c0_i32_1 = arith.constant 0 : i32
    return %c0_i32, %c0_i32_0 : i32, i32
  }
  func.func @transform_3(%arg0: i32) -> (i32, i32) {
    %c0_i32 = arith.constant 0 : i32
    %c0_i32_0 = arith.constant 0 : i32
    %c0_i32_1 = arith.constant 0 : i32
    return %c0_i32, %c0_i32_0 : i32, i32
  }
  func.func @transform_4(%arg0: i32) -> (i32, i32) {
    %c0_i32 = arith.constant 0 : i32
    %c0_i32_0 = arith.constant 0 : i32
    %c0_i32_1 = arith.constant 0 : i32
    return %c0_i32, %c0_i32_0 : i32, i32
  }
  func.func @transform_5(%arg0: i32) -> (i32, i32) {
    %c0_i32 = arith.constant 0 : i32
    %c0_i32_0 = arith.constant 0 : i32
    %c0_i32_1 = arith.constant 0 : i32
    return %c0_i32, %c0_i32_0 : i32, i32
  }
  func.func @transform_6(%arg0: i32) -> (i32, i32) {
    %c0_i32 = arith.constant 0 : i32
    %c0_i32_0 = arith.constant 0 : i32
    %c0_i32_1 = arith.constant 0 : i32
    return %c0_i32, %c0_i32_0 : i32, i32
  }
  func.func @transform_7(%arg0: i32) -> (i32, i32) {
    %c0_i32 = arith.constant 0 : i32
    %c0_i32_0 = arith.constant 0 : i32
    %c0_i32_1 = arith.constant 0 : i32
    return %c0_i32, %c0_i32_0 : i32, i32
  }
  func.func @transform_8(%arg0: i32) -> (i32, i32) {
    %c0_i32 = arith.constant 0 : i32
    %c0_i32_0 = arith.constant 0 : i32
    %c0_i32_1 = arith.constant 0 : i32
    return %c0_i32, %c0_i32_0 : i32, i32
  }
  func.func @transform_9(%arg0: i32) -> (i32, i32) {
    %c0_i32 = arith.constant 0 : i32
    %c0_i32_0 = arith.constant 0 : i32
    %c0_i32_1 = arith.constant 0 : i32
    return %c0_i32, %c0_i32_0 : i32, i32
  }
  func.func @transform_10(%arg0: i32) -> (i32, i32) {
    %c0_i32 = arith.constant 0 : i32
    %c0_i32_0 = arith.constant 0 : i32
    %c0_i32_1 = arith.constant 0 : i32
    return %c0_i32, %c0_i32_0 : i32, i32
  }
  func.func @transform_11(%arg0: i32) -> (i32, i32) {
    %c0_i32 = arith.constant 0 : i32
    %c0_i32_0 = arith.constant 0 : i32
    %c0_i32_1 = arith.constant 0 : i32
    return %c0_i32, %c0_i32_0 : i32, i32
  }
  func.func @transform_12(%arg0: i32) -> (i32, i32) {
    %c0_i32 = arith.constant 0 : i32
    %c0_i32_0 = arith.constant 0 : i32
    %c0_i32_1 = arith.constant 0 : i32
    return %c0_i32, %c0_i32_0 : i32, i32
  }
  func.func @transform_13(%arg0: i32) -> (i32, i32) {
    %c0_i32 = arith.constant 0 : i32
    %c0_i32_0 = arith.constant 0 : i32
    %c0_i32_1 = arith.constant 0 : i32
    return %c0_i32, %c0_i32_0 : i32, i32
  }
  func.func @transform_14(%arg0: i32) -> (i32, i32) {
    %c0_i32 = arith.constant 0 : i32
    %c0_i32_0 = arith.constant 0 : i32
    %c0_i32_1 = arith.constant 0 : i32
    return %c0_i32, %c0_i32_0 : i32, i32
  }
  func.func @transform_15(%arg0: i32) -> (i32, i32) {
    %c0_i32 = arith.constant 0 : i32
    %c0_i32_0 = arith.constant 0 : i32
    return %arg0, %c0_i32 : i32, i32
  }
}

</mosaic_0001>

<bundles_post_ra>
// kernel: lenet5_forward.1
= control target key start
LH: loop header
LB: loop body
LE: loop exit
PB: predicated region body
PF: predicated region fallthrough
CT: control target
= control target key end

     0   :  { %vm60_vm0 = vcmask 1041408   ;;  %vm77_vm1 = vcmask 1046528   ;;  %vm116_vm2 = vcmask 1044480   ;;  %vm73_vm3 = vcmask 1045504   ;;  %s3062_s21 = smov 28   ;;  %s3063_s22 = smov 84   ;;  %s4334_s0 = inlined_call_operand.vmem [shape: f32[2,28,28], index: 0, kind: input, shape index: {}]   ;;  %s4335_s1 = inlined_call_operand.vmem [shape: bf16[140,168], index: 1, kind: input, shape index: {}]   ;;  %s4336_s2 = inlined_call_operand.vmem [shape: f32[1,168], index: 2, kind: input, shape index: {}]   ;;  %s4337_s3 = inlined_call_operand.vmem [shape: bf16[14,28], index: 3, kind: input, shape index: {}]   ;;  %s4338_s4 = inlined_call_operand.vmem [shape: bf16[168,84], index: 4, kind: input, shape index: {}]   ;;  %s4339_s5 = inlined_call_operand.vmem [shape: bf16[420,160], index: 5, kind: input, shape index: {}]   ;;  %s4340_s6 = inlined_call_operand.vmem [shape: f32[1,160], index: 6, kind: input, shape index: {}]   ;;  %s4341_s7 = inlined_call_operand.vmem [shape: bf16[5,10], index: 7, kind: input, shape index: {}]   ;;  %s4342_s8 = inlined_call_operand.vmem [shape: bf16[160,80], index: 8, kind: input, shape index: {}]   ;;  %s4343_s9 = inlined_call_operand.vmem [shape: bf16[400,128], index: 9, kind: input, shape index: {}]   ;;  %s4344_s10 = inlined_call_operand.vmem [shape: f32[1,128], index: 10, kind: input, shape index: {}]   ;;  %s4345_s11 = inlined_call_operand.vmem [shape: bf16[128,128], index: 11, kind: input, shape index: {}]   ;;  %s4346_s12 = inlined_call_operand.vmem [shape: f32[1,128], index: 12, kind: input, shape index: {}]   ;;  %s4347_s13 = inlined_call_operand.vmem [shape: bf16[128,128], index: 13, kind: input, shape index: {}]   ;;  %s4348_s14 = inlined_call_operand.vmem [shape: f32[1,128], index: 14, kind: input, shape index: {}]   ;;  %s4349_s15 = inlined_call_operand.hbm [shape: f32[2,128], index: 15, kind: output, shape index: {}]  }
   0x1   :  { %v52_v0 = vld [vmem:[%s4334_s0] sm:$0xff]  ;;  %v53_v1 = vld [vmem:[%s4334_s0 + $0x8] sm:$0xff]  ;;  %v54_v2 = vld [vmem:[%s4334_s0 + $0x10] sm:$0xff]  ;;  %vm136_vm4 = vcmask 1043456   ;;  %s3064_s27 = smov 56   ;;  %s3065_s28 = smov 112  }
   0x2   :  { %v61_v3 = vrot.slane %v52_v0, 6  ;;  %v62_v4 = vrot.slane %v53_v1, 6  ;;  %v64_v5 = vrot.slane %v54_v2, 6  ;;  %v55_v6 = vld [vmem:[%s4334_s0 + $0x18] sm:$0xf]  ;;  %v2820_v56 = vld [vmem:[%s4338_s4] sm:$0xff]  }
   0x3   :  { %v66_v10 = vrot.slane %v55_v6, 6  ;;  %v2793_v11 = vld [vmem:[%s4335_s1 + $0x4] ss:$8 sps:$4 sm:$0xff]   ;;  %v2795_v16 = vld [vmem:[%s4335_s1] ss:$8 sps:$4 sm:$0xff]   ;;  %v4352_v58 = vmov 0  }
   0x4   :  { %v3168_v7 = vsel %vm60_vm0, %v61_v3, %v62_v4  ;;  %v3171_v8 = vsel %vm60_vm0, %v62_v4, %v64_v5  ;;  %v3174_v9 = vsel %vm60_vm0, 0.0, %v61_v3  ;;  %311 = vmatprep.subr.bf16.mxu0 %v2793_v11  ;;  %v2796_v25 = vld [vmem:[%s4335_s1 + $0x14] ss:$8 sps:$4 sm:$0xff]   ;;  %v2798_v26 = vld [vmem:[%s4335_s1 + $0x10] ss:$8 sps:$4 sm:$0xff]   ;;  %472 = vmatprep.subr.bf16.mxu1 %v4352_v58  ;;  %v2821_v60 = vld [vmem:[%s4338_s4 + $0x8] sm:$0xff]  }
   0x5   :  { %v78_v12 = vrot.slane %v3174_v9, 1  ;;  %v79_v13 = vrot.slane %v3168_v7, 1  ;;  %v81_v14 = vrot.slane %v3171_v8, 1  ;;  %v117_v15 = vrot.slane %v3174_v9, 3  ;;  %312 = vmatpush1.bf16.msra.mxu0 %v2795_v16  ;;  %v2799_v31 = vld [vmem:[%s4335_s1 + $0x24] ss:$8 sps:$4 sm:$0xff]   ;;  %473 = vmatpush1.bf16.msra.mxu1 %v2820_v56 }
   0x6   :  { %v118_v17 = vrot.slane %v3168_v7, 3  ;;  %v120_v18 = vrot.slane %v3171_v8, 3  ;;  %v97_v19 = vrot.slane %v3174_v9, 2  ;;  %v98_v20 = vrot.slane %v3168_v7, 2  ;;  %313 = vmatprep.subr.bf16.mxu0 %v2796_v25  ;;  %v2801_v45 = vld [vmem:[%s4335_s1 + $0x20] ss:$8 sps:$4 sm:$0xff]   ;;  %474 = vmatprep.subr.bf16.mxu1 %v4352_v58 }
   0x7   :  { %v80_v21 = vsel %vm77_vm1, %v78_v12, %v79_v13  ;;  %v82_v22 = vsel %vm77_vm1, %v79_v13, %v81_v14  ;;  %v100_v23 = vrot.slane %v3171_v8, 2  ;;  %v137_v24 = vrot.slane %v3174_v9, 4  ;;  %v2802_v47 = vld [vmem:[%s4335_s1 + $0x34] ss:$8 sps:$4 sm:$0xff]   ;;  %v2804_v54 = vld [vmem:[%s4335_s1 + $0x30] ss:$8 sps:$4 sm:$0xff]  }
   0x8   :  { %v2663_v27 = vpack.i.bf16 %v82_v22, %v80_v21  ;;  %v119_v28 = vsel %vm116_vm2, %v117_v15, %v118_v17  ;;  %v121_v29 = vsel %vm116_vm2, %v118_v17, %v120_v18  ;;  %v99_v30 = vsel %vm73_vm3, %v97_v19, %v98_v20  ;;  %v2805_v55 = vld [vmem:[%s4335_s1 + $0x44] ss:$8 sps:$4 sm:$0xff]   ;;  %v2807_v61 = vld [vmem:[%s4335_s1 + $0x40] ss:$8 sps:$4 sm:$0xff]   ;;  %v2808_v62 = vld [vmem:[%s4335_s1 + $0x54] ss:$8 sps:$4 sm:$0xff]  }
   0x9   :  { %v2673_v32 = vpack.i.bf16 %v121_v29, %v119_v28  ;;  %v101_v33 = vsel %vm73_vm3, %v98_v20, %v100_v23  ;;  %v138_v34 = vrot.slane %v3168_v7, 4  ;;  %v140_v35 = vrot.slane %v3171_v8, 4  ;;  %314 = vmatpush1.bf16.msra.mxu0 %v2798_v26  ;;  %v2810_v63 = vld [vmem:[%s4335_s1 + $0x50] ss:$8 sps:$4 sm:$0xff]   ;;  %v2811_v0 = vld [vmem:[%s4335_s1 + $0x64] ss:$8 sps:$4 sm:$0xff]   ;;  %475 = vmatpush1.bf16.msra.mxu1 %v2821_v60 }
   0xa   :  { %2664 = vrot.lane.b32.xlu0 %v2663_v27, %s3062_s21  ;;  %v2668_v36 = vpack.i.bf16 %v101_v33, %v99_v30  ;;  %v67_v37 = vsel %vm60_vm0, %v64_v5, %v66_v10  ;;  %315 = vmatprep.subr.bf16.mxu0 %v2799_v31  ;;  %v2822_v1 = vld [vmem:[%s4338_s4 + $0x10] sm:$0xff]   ;;  %v2823_v2 = vld [vmem:[%s4338_s4 + $0x18] sm:$0xff]   ;;  %v2813_v3 = vld [vmem:[%s4335_s1 + $0x60] ss:$8 sps:$4 sm:$0xff]  }
   0xb   :  { %2674 = vrot.lane.b32.xlu1 %v2673_v32, %s3063_s22  ;;  %v139_v38 = vsel %vm136_vm4, %v137_v24, %v138_v34  ;;  %v141_v39 = vsel %vm136_vm4, %v138_v34, %v140_v35  ;;  %v3215_v40 = vsel %vm73_vm3, %v67_v37, 0.0  ;;  %476 = vmatprep.subr.bf16.mxu1 %v4352_v58  ;;  %v2814_v4 = vld [vmem:[%s4335_s1 + $0x74] ss:$8 sps:$4 sm:$0xff]   ;;  %v2824_v5 = vld [vmem:[%s4338_s4 + $0x20] sm:$0xff]   ;;  %v2816_v6 = vld [vmem:[%s4335_s1 + $0x70] ss:$8 sps:$4 sm:$0xff]  }
   0xc   :  { %v2678_v41 = vpack.i.bf16 %v141_v39, %v139_v38  ;;  %v83_v42 = vrot.slane %v3215_v40, 1  ;;  %v102_v43 = vrot.slane %v3215_v40, 2  ;;  %v122_v44 = vrot.slane %v3215_v40, 3  ;;  %v2817_v10 = vld [vmem:[%s4335_s1 + $0x84] ss:$8 sps:$4 sm:$0x3f]  }
   0xd   :  { %v142_v46 = vrot.slane %v3215_v40, 4  ;;  %316 = vmatpush1.bf16.msra.mxu0 %v2801_v45  ;;  %477 = vmatpush1.bf16.msra.mxu1 %v2822_v1  ;;  %v2819_v11 = vld [vmem:[%s4335_s1 + $0x80] ss:$8 sps:$4 sm:$0x3f]  }
   0xe   :  { %2669 = vrot.lane.b32.xlu0 %v2668_v36, %s3064_s27  ;;  %v84_v48 = vsel %vm77_vm1, %v81_v14, %v83_v42  ;;  %v103_v49 = vsel %vm73_vm3, %v100_v23, %v102_v43  ;;  %v123_v52 = vsel %vm116_vm2, %v120_v18, %v122_v44  ;;  %317 = vmatprep.subr.bf16.mxu0 %v2802_v47  ;;  %v2825_v12 = vld [vmem:[%s4338_s4 + $0x28] sm:$0xff]   ;;  %v3296_v13 = vsel %vm73_vm3, %v2819_v11, 0 }
   0xf   :  { %2679 = vrot.lane.b32.xlu1 %v2678_v41, %s3065_s28  ;;  %v2683_v50 = vpack.i.bf16 %v83_v42, %v84_v48  ;;  %v2688_v51 = vpack.i.bf16 %v102_v43, %v103_v49  ;;  %v143_v53 = vsel %vm136_vm4, %v140_v35, %v142_v46  ;;  %v2693_v57 = vpack.i.bf16 %v122_v44, %v123_v52 }
  0x10   :  { %v2698_v59 = vpack.i.bf16 %v142_v46, %v143_v53  ;;  %478 = vmatprep.subr.bf16.mxu1 %v4352_v58 }
  0x11   :  { %318 = vmatpush1.bf16.msra.mxu0 %v2804_v54  ;;  %479 = vmatpush1.bf16.msra.mxu1 %v2823_v2 }
  0x12   :  { %2684 = vrot.lane.b32.xlu0 %v2683_v50, %s3062_s21  ;;  %319 = vmatprep.subr.bf16.mxu0 %v2805_v55 }
  0x13   :  { %2689 = vrot.lane.b32.xlu1 %v2688_v51, %s3064_s27  ;;  %480 = vmatprep.subr.bf16.mxu1 %v4352_v58 }
  0x15   :  { %320 = vmatpush1.bf16.msra.mxu0 %v2807_v61  ;;  %481 = vmatpush1.bf16.msra.mxu1 %v2824_v5 }
  0x16   :  { %2694 = vrot.lane.b32.xlu0 %v2693_v57, %s3063_s22  ;;  %321 = vmatprep.subr.bf16.mxu0 %v2808_v62 }
  0x17   :  { %2699 = vrot.lane.b32.xlu1 %v2698_v59, %s3065_s28  ;;  %482 = vmatprep.subr.bf16.mxu1 %v4352_v58 }
  0x19   :  { %322 = vmatpush1.bf16.msra.mxu0 %v2810_v63  ;;  %483 = vmatpush1.bf16.msra.mxu1 %v2825_v12 }
  0x1a   :  { %323 = vmatprep.subr.bf16.mxu0 %v2811_v0  ;;  %484 = vmatprep.subr.bf16.mxu1 %v4352_v58 }
  0x1d   :  { %324 = vmatpush1.bf16.msra.mxu0 %v2813_v3 }
  0x1e   :  { %325 = vmatprep.subr.bf16.mxu0 %v2814_v4 }
  0x21   :  { %326 = vmatpush1.bf16.msra.mxu0 %v2816_v6 }
  0x22   :  { %2371 = vmatprep.subr.msk.bf16.mxu0 %vm73_vm3, %v2817_v10 }
  0x25   :  { %328 = vmatpush1.bf16.msra.mxu0 %v3296_v13 }
  0x26   :  { %1144 = vmatprep.subr.bf16.mxu0 %v4352_v58 }
  0x27   :  { %20 = vsyncpa [#allocation3], 0  ;;  %vm156_vm5 = vcmask 228352   ;;  %vm161_vm6 = vcmask 457728   ;;  %vm166_vm7 = vcmask 687104   ;;  %vm171_vm8 = vcmask 916480  }
  0x28   :  { %vm298_vm9 = vcmask 97280   ;;  %v3326_v55 = vld [vmem:[%s4338_s4 + $0x30] sm:$0xff]   ;;  %v3333_v56 = vld [vmem:[%s4338_s4 + $0x38] sm:$0xff]   ;;  %v3340_v57 = vld [vmem:[%s4338_s4 + $0x40] sm:$0xff]   ;;  %v200_v62 = vlaneseq  ;;  %vm462_vm10 = vcmask 326656   ;;  %vm3068_vm11 = vmmov 0  }
  0x29   :  { %485 = vmatpush1.bf16.msra.mxu1 %v3326_v55  ;;  %v3347_v59 = vld [vmem:[%s4338_s4 + $0x48] sm:$0xff]   ;;  %v2830_v60 = vld [vmem:[%s4338_s4 + $0x50] ss:$0 sps:$4 sm:$0xff]   ;;  %v198_v1 = vld [vmem:[%s4336_s2] sm:$0x3]  ;;  %s3069_s18 = smov 40  }
  0x2a   :  { %486 = vmatprep.subr.bf16.mxu1 %v4352_v58  ;;  %v3355_v61 = vsel %vm136_vm4, %v2830_v60, 0  ;;  %v3358_v63 = vshrl.u32 %v200_v62, 7  ;;  %v3445_v60 = vld [vmem:[%s4339_s5 + $0x44] ss:$8 sps:$4 sm:$0xff]   ;;  %v3451_v62 = vld [vmem:[%s4339_s5 + $0x40] ss:$8 sps:$4 sm:$0xff]  }
  0x2b   :  { %s3070_s19 = smov 80   ;;  %s3071_s20 = smov 124   ;;  %vm617_vm12 = vcmask 1014784   ;;  %vm957_vm13 = vcmask 293888   ;;  %vm620_vm14 = vcmask 654336   ;;  %vm4393_vm15 = vcmask 261120  }
  0x2c   :  { %v4351_v0 = vsub.s32 0, %v3358_v63  ;;  %v4350_v2 = vsub.s32 1, %v3358_v63  ;;  %s3074_s16 = smov [#allocation2]  }
  0x2d   :  { %487 = vmatpush1.bf16.msra.mxu1 %v3333_v56 }
  0x2e   :  { %488 = vmatprep.subr.bf16.mxu1 %v4352_v58  ;;  %v3367_v3 = vrot.slane %v198_v1, %v4351_v0  ;;  %v3371_v4 = vrot.slane %v198_v1, %v4350_v2  ;;  %v3457_v1 = vld [vmem:[%s4339_s5 + $0x54] ss:$8 sps:$4 sm:$0xff]  }
  0x31   :  { %489 = vmatpush1.bf16.msra.mxu1 %v3340_v57 }
  0x32   :  { %490 = vmatprep.subr.bf16.mxu1 %v4352_v58 }
  0x35   :  { %491 = vmatpush1.bf16.msra.mxu1 %v3347_v59 }
  0x36   :  { %492 = vmatprep.subr.bf16.mxu1 %v4352_v58 }
  0x39   :  { %493 = vmatpush1.bf16.msra.mxu1 %v3355_v61 }
  0x7c   :  { %v2665_v14 = vpop.permute.xlu0 %2664 }
  0x7d   :  { %v2675_v15 = vpop.permute.xlu1 %2674  ;;  %v2667_v16 = vunpack.i.h.bf16 %v2665_v14  ;;  %v2666_v17 = vunpack.i.l.bf16 %v2665_v14 }
  0x7e   :  { %v2677_v19 = vunpack.i.h.bf16 %v2675_v15  ;;  %v2676_v20 = vunpack.i.l.bf16 %v2675_v15 }
  0x7f   :  { %v158_v24 = vsel %vm156_vm5, %v3168_v7, %v2667_v16  ;;  %v157_v25 = vsel %vm156_vm5, %v3174_v9, %v2666_v17 }
  0x80   :  { %v2670_v18 = vpop.permute.xlu0 %2669 }
  0x81   :  { %v2672_v21 = vunpack.i.h.bf16 %v2670_v18  ;;  %v2671_v22 = vunpack.i.l.bf16 %v2670_v18  ;;  %v2680_v23 = vpop.permute.xlu1 %2679 }
  0x82   :  { %v2682_v26 = vunpack.i.h.bf16 %v2680_v23  ;;  %v2681_v27 = vunpack.i.l.bf16 %v2680_v23 }
  0x83   :  { %v162_v28 = vsel %vm161_vm6, %v157_v25, %v2671_v22  ;;  %v163_v29 = vsel %vm161_vm6, %v158_v24, %v2672_v21 }
  0x84   :  { %v2685_v30 = vpop.permute.xlu0 %2684  ;;  %v177_v31 = vpack.c.bf16 %v2682_v26, %v2681_v27  ;;  %v167_v32 = vsel %vm166_vm7, %v162_v28, %v2676_v20  ;;  %v168_v33 = vsel %vm166_vm7, %v163_v29, %v2677_v19 }
  0x85   :  { %v2687_v34 = vunpack.i.h.bf16 %v2685_v30  ;;  %v2686_v35 = vunpack.i.l.bf16 %v2685_v30  ;;  %v2690_v36 = vpop.permute.xlu1 %2689  ;;  %v172_v7 = vsel %vm171_vm8, %v167_v32, %v2681_v27  ;;  %v173_v9 = vsel %vm171_vm8, %v168_v33, %v2682_v26 }
  0x86   :  { %v2692_v37 = vunpack.i.h.bf16 %v2690_v36  ;;  %v2691_v38 = vunpack.i.l.bf16 %v2690_v36  ;;  %2372 = vmatprep.mubr.msk.bf16.mxu0 %vm298_vm9, %v177_v31  ;;  %v176_v39 = vpack.c.bf16 %v173_v9, %v172_v7  ;;  %v4354_v7 = vmov 0.0  }
  0x87   :  { %v160_v41 = vsel %vm156_vm5, %v3215_v40, %v2687_v34  ;;  %v159_v42 = vsel %vm156_vm5, %v3171_v8, %v2686_v35  ;;  %2566 = vmatprep.subr.bf16.mxu1 %v4354_v7 }
  0x88   :  { %v164_v43 = vsel %vm161_vm6, %v159_v42, %v2691_v38  ;;  %v165_v44 = vsel %vm161_vm6, %v160_v41, %v2692_v37  ;;  %v2695_v45 = vpop.permute.xlu0 %2694  ;;  %344 = vmatmul.mubr.bf16.vlgmr.msra.gmra.mrb[0].mxu0 %v176_v39 }
  0x89   :  { %v2697_v46 = vunpack.i.h.bf16 %v2695_v45  ;;  %v2696_v47 = vunpack.i.l.bf16 %v2695_v45  ;;  %v2700_v48 = vpop.permute.xlu1 %2699 }
  0x8a   :  { %v2702_v49 = vunpack.i.h.bf16 %v2700_v48  ;;  %v2701_v50 = vunpack.i.l.bf16 %v2700_v48  ;;  %v3391_v48 = vld [vmem:[%s4337_s3] sm:$0x7f]  }
  0x8b   :  { %v169_v51 = vsel %vm166_vm7, %v164_v43, %v2696_v47  ;;  %v170_v52 = vsel %vm166_vm7, %v165_v44, %v2697_v46 }
  0x8c   :  { %v179_v53 = vpack.c.bf16 %v2702_v49, %v2701_v50  ;;  %v174_v40 = vsel %vm171_vm8, %v169_v51, %v2701_v50  ;;  %v175_v8 = vsel %vm171_vm8, %v170_v52, %v2702_v49  ;;  %v3398_v49 = vld [vmem:[%s4339_s5] ss:$8 sps:$4 sm:$0xff]   ;;  %v3403_v50 = vld [vmem:[%s4339_s5 + $0x4] ss:$8 sps:$4 sm:$0xff]   ;;  %v3408_v51 = vld [vmem:[%s4339_s5 + $0x14] ss:$8 sps:$4 sm:$0xff]  }
  0x8d   :  { %v178_v54 = vpack.c.bf16 %v175_v8, %v174_v40  ;;  %v3415_v52 = vld [vmem:[%s4339_s5 + $0x10] ss:$8 sps:$4 sm:$0xff]   ;;  %v3427_v40 = vld [vmem:[%s4339_s5 + $0x20] ss:$8 sps:$4 sm:$0xff]   ;;  %v3433_v8 = vld [vmem:[%s4339_s5 + $0x34] ss:$8 sps:$4 sm:$0xff]  }
  0x8e   :  { %2373 = vmatprep.mubr.msk.bf16.mxu0 %vm298_vm9, %v179_v53  ;;  %v3421_v53 = vld [vmem:[%s4339_s5 + $0x24] ss:$8 sps:$4 sm:$0xff]  }
  0x90   :  { %354 = vmatmul.mubr.bf16.gmra.mrb[4].mxu0 %v178_v54  ;;  %v3439_v54 = vld [vmem:[%s4339_s5 + $0x30] ss:$8 sps:$4 sm:$0xff]  }
 0x15b   :  { %v345_v5 = vpop.f32.mrb[0].mxu0 }
 0x15c   :  { %v346_v6 = vadd.f32 %v345_v5, %v3367_v3  ;;  %v347_v10 = vpop.f32.mrb[1].mxu0  ;;  %v3463_v5 = vld [vmem:[%s4339_s5 + $0x50] ss:$8 sps:$4 sm:$0xff]  }
 0x15d   :  { %v348_v11 = vadd.f32 %v347_v10, %v3371_v4  ;;  %v349_v12 = vpop.f32.mrb[2].mxu0  ;;  %v3475_v10 = vld [vmem:[%s4339_s5 + $0x60] ss:$8 sps:$4 sm:$0xff]  }
 0x15e   :  { %2963 = vtanh.f32 %v346_v6  ;;  %v350_v14 = vadd.f32 %v349_v12, %v3367_v3  ;;  %v351_v15 = vpop.f32.mrb[3].mxu0  ;;  %v3469_v6 = vld [vmem:[%s4339_s5 + $0x64] ss:$8 sps:$4 sm:$0xff]   ;;  %v3487_v12 = vld [vmem:[%s4339_s5 + $0x70] ss:$8 sps:$4 sm:$0xff]  }
 0x15f   :  { %2965 = vtanh.f32 %v348_v11  ;;  %v352_v16 = vadd.f32 %v351_v15, %v3371_v4  ;;  %v3481_v11 = vld [vmem:[%s4339_s5 + $0x74] ss:$8 sps:$4 sm:$0xff]   ;;  %v3499_v15 = vld [vmem:[%s4339_s5 + $0x80] ss:$8 sps:$4 sm:$0xff]  }
 0x160   :  { %2967 = vtanh.f32 %v350_v14  ;;  %v3493_v14 = vld [vmem:[%s4339_s5 + $0x84] ss:$8 sps:$4 sm:$0xff]   ;;  %4394 = vst [vmem:[#allocation5_spill] sm:$0xff] %v3499_v15 }
 0x161   :  { %2969 = vtanh.f32 %v352_v16  ;;  %v3505_v16 = vld [vmem:[%s4339_s5 + $0x94] ss:$8 sps:$4 sm:$0xff]  }
 0x162   :  { %4395 = vst [vmem:[#allocation6_spill] sm:$0xff] %v3505_v16 }
 0x163   :  { %v355_v17 = vpop.f32.mrb[4].mxu0 }
 0x164   :  { %v356_v18 = vadd.f32 %v355_v17, %v3367_v3  ;;  %v357_v19 = vpop.f32.mrb[5].mxu0  ;;  %v3511_v17 = vld [vmem:[%s4339_s5 + $0x90] ss:$8 sps:$4 sm:$0xff]  }
 0x165   :  { %v358_v20 = vadd.f32 %v357_v19, %v3371_v4  ;;  %v359_v21 = vpop.f32.mrb[6].mxu0  ;;  %4396 = vst [vmem:[#allocation7_spill] sm:$0xff] %v3511_v17  ;;  %v3523_v19 = vld [vmem:[%s4339_s5 + $0xa0] ss:$8 sps:$4 sm:$0xff]  }
 0x166   :  { %2971 = vtanh.f32 %v356_v18  ;;  %v360_v22 = vadd.f32 %v359_v21, %v3367_v3  ;;  %v361_v23 = vpop.f32.mrb[7].mxu0  ;;  %v3517_v18 = vld [vmem:[%s4339_s5 + $0xa4] ss:$8 sps:$4 sm:$0xff]   ;;  %4398 = vst [vmem:[#allocation9_spill] sm:$0xff] %v3523_v19  ;;  %v3535_v21 = vld [vmem:[%s4339_s5 + $0xb0] ss:$8 sps:$4 sm:$0xff]  }
 0x167   :  { %2973 = vtanh.f32 %v358_v20  ;;  %v362_v24 = vadd.f32 %v361_v23, %v3371_v4  ;;  %4397 = vst [vmem:[#allocation8_spill] sm:$0xff] %v3517_v18  ;;  %v3529_v20 = vld [vmem:[%s4339_s5 + $0xb4] ss:$8 sps:$4 sm:$0xff]   ;;  %4400 = vst [vmem:[#allocation11_spill] sm:$0xff] %v3535_v21  ;;  %v3547_v23 = vld [vmem:[%s4339_s5 + $0xc0] ss:$8 sps:$4 sm:$0xff]  }
 0x168   :  { %v2964_v25 = vpop.eup %2963  ;;  %2975 = vtanh.f32 %v360_v22  ;;  %4399 = vst [vmem:[#allocation10_spill] sm:$0xff] %v3529_v20  ;;  %v3541_v22 = vld [vmem:[%s4339_s5 + $0xc4] ss:$8 sps:$4 sm:$0xff]   ;;  %4402 = vst [vmem:[#allocation13_spill] sm:$0xff] %v3547_v23 }
 0x169   :  { %v2966_v26 = vpop.eup %2965  ;;  %2977 = vtanh.f32 %v362_v24  ;;  %4401 = vst [vmem:[#allocation12_spill] sm:$0xff] %v3541_v22  ;;  %v3553_v24 = vld [vmem:[%s4339_s5 + $0xd4] ss:$8 sps:$4 sm:$0xff]  }
 0x16a   :  { %v2968_v27 = vpop.eup %2967  ;;  %4403 = vst [vmem:[#allocation14_spill] sm:$0xff] %v3553_v24 }
 0x16b   :  { %v2970_v28 = vpop.eup %2969  ;;  %v374_v29 = vpack.c.bf16 %v2968_v27, %v2964_v25  ;;  %v3559_v25 = vld [vmem:[%s4339_s5 + $0xd0] ss:$8 sps:$4 sm:$0xff]   ;;  %v3571_v27 = vld [vmem:[%s4339_s5 + $0xe0] ss:$8 sps:$4 sm:$0xff]  }
 0x16c   :  { %v375_v30 = vpack.c.bf16 %v2970_v28, %v2966_v26  ;;  %4404 = vst [vmem:[#allocation15_spill] sm:$0xff] %v3559_v25  ;;  %v3566_v26 = vld [vmem:[%s4339_s5 + $0xe4] ss:$8 sps:$4 sm:$0xff]   ;;  %4406 = vst [vmem:[#allocation17_spill] sm:$0xff] %v3571_v27  ;;  %v3578_v28 = vld [vmem:[%s4339_s5 + $0xf4] ss:$8 sps:$4 sm:$0xff]  }
 0x16d   :  { %4405 = vst [vmem:[#allocation16_spill] sm:$0xff] %v3566_v26  ;;  %4407 = vst [vmem:[#allocation18_spill] sm:$0xff] %v3578_v28 }
 0x16e   :  { %2385 = vmatprep.mubr.msk.bf16.mxu1 %vm462_vm10, %v375_v30 }
 0x16f   :  { %505 = vmatmul.mubr.bf16.vlgmr.msra.gmra.mrb[0].mxu1 %v374_v29  ;;  %v3583_v29 = vld [vmem:[%s4339_s5 + $0xf0] ss:$8 sps:$4 sm:$0xff]  }
 0x170   :  { %v2972_v31 = vpop.eup %2971  ;;  %4408 = vst [vmem:[#allocation19_spill] sm:$0xff] %v3583_v29 }
 0x171   :  { %v2974_v32 = vpop.eup %2973 }
 0x172   :  { %v2976_v33 = vpop.eup %2975 }
 0x173   :  { %v2978_v34 = vpop.eup %2977  ;;  %v376_v35 = vpack.c.bf16 %v2976_v33, %v2972_v31 }
 0x174   :  { %v377_v36 = vpack.c.bf16 %v2978_v34, %v2974_v32 }
 0x176   :  { %2386 = vmatprep.mubr.msk.bf16.mxu1 %vm462_vm10, %v377_v36 }
 0x177   :  { %513 = vmatmul.mubr.bf16.gmra.mrb[4].mxu1 %v376_v35 }
 0x178   :  { %2570 = vmatprep.mubr.msk.bf16.mxu1 %vm3068_vm11, %v4354_v7 }
 0x242   :  { %v506_v9 = vpop.f32.mrb[0].mxu1 }
 0x243   :  { %v508_v37 = vpop.f32.mrb[1].mxu1 }
 0x244   :  { %v509_v38 = vpop.f32.mrb[2].mxu1 }
 0x245   :  { %v521_v39 = vpack.c.bf16 %v509_v38, %v506_v9  ;;  %v511_v41 = vpop.f32.mrb[3].mxu1 }
 0x247   :  { %2567 = vmatpush3.bf16.msra.mxu1 %v521_v39 }
 0x248   :  { %2568 = vmatprep.subr.bf16.mxu1 %v4354_v7 }
 0x24a   :  { %v514_v42 = vpop.f32.mrb[4].mxu1 }
 0x24b   :  { %v516_v43 = vpop.f32.mrb[5].mxu1 }
 0x24c   :  { %v517_v44 = vpop.f32.mrb[6].mxu1 }
 0x24d   :  { %v522_v45 = vpack.c.bf16 %v517_v44, %v514_v42  ;;  %v519_v46 = vpop.f32.mrb[7].mxu1  ;;  %v3590_v42 = vld [vmem:[%s4339_s5 + $0x104] ss:$8 sps:$4 sm:$0xff]  }
 0x24e   :  { %4409 = vst [vmem:[#allocation20_spill] sm:$0xff] %v3590_v42 }
 0x24f   :  { %v532_v47 = vsel %vm73_vm3, %v522_v45, 0 }
 0x250   :  { %2569 = vmatpush3.bf16.msra.mxu1 %v532_v47 }
 0x251   :  { %967 = vmatprep.subr.bf16.mxu1 %v3403_v50 }
 0x253   :  { %2571 = vmatmul.mubr.msk.bf16.vlgmr.msra.gmra.mrb[8].mxu1 %vm156_vm5, %v3391_v48 }
 0x254   :  { %968 = vmatpush1.bf16.msra.mxu1 %v3398_v49 }
 0x255   :  { %969 = vmatprep.subr.bf16.mxu1 %v3408_v51 }
 0x258   :  { %970 = vmatpush1.bf16.msra.mxu1 %v3415_v52 }
 0x259   :  { %971 = vmatprep.subr.bf16.mxu1 %v3421_v53 }
 0x25c   :  { %972 = vmatpush1.bf16.msra.mxu1 %v3427_v40 }
 0x25d   :  { %973 = vmatprep.subr.bf16.mxu1 %v3433_v8 }
 0x260   :  { %974 = vmatpush1.bf16.msra.mxu1 %v3439_v54 }
 0x261   :  { %975 = vmatprep.subr.bf16.mxu1 %v3445_v60 }
 0x264   :  { %976 = vmatpush1.bf16.msra.mxu1 %v3451_v62 }
 0x265   :  { %977 = vmatprep.subr.bf16.mxu1 %v3457_v1 }
 0x268   :  { %978 = vmatpush1.bf16.msra.mxu1 %v3463_v5 }
 0x269   :  { %979 = vmatprep.subr.bf16.mxu1 %v3469_v6 }
 0x26c   :  { %980 = vmatpush1.bf16.msra.mxu1 %v3475_v10 }
 0x26d   :  { %981 = vmatprep.subr.bf16.mxu1 %v3481_v11 }
 0x270   :  { %982 = vmatpush1.bf16.msra.mxu1 %v3487_v12 }
 0x271   :  { %983 = vmatprep.subr.bf16.mxu1 %v3493_v14 }
 0x274   :  { %984 = vmatpush1.bf16.msra.mxu1 %v3499_v15 }
 0x275   :  { %985 = vmatprep.subr.bf16.mxu1 %v3505_v16 }
 0x278   :  { %986 = vmatpush1.bf16.msra.mxu1 %v3511_v17 }
 0x279   :  { %987 = vmatprep.subr.bf16.mxu1 %v3517_v18 }
 0x27c   :  { %988 = vmatpush1.bf16.msra.mxu1 %v3523_v19 }
 0x27d   :  { %989 = vmatprep.subr.bf16.mxu1 %v3529_v20 }
 0x280   :  { %990 = vmatpush1.bf16.msra.mxu1 %v3535_v21 }
 0x281   :  { %991 = vmatprep.subr.bf16.mxu1 %v3541_v22 }
 0x284   :  { %992 = vmatpush1.bf16.msra.mxu1 %v3547_v23 }
 0x285   :  { %993 = vmatprep.subr.bf16.mxu1 %v3553_v24 }
 0x288   :  { %994 = vmatpush1.bf16.msra.mxu1 %v3559_v25 }
 0x289   :  { %995 = vmatprep.subr.bf16.mxu1 %v3566_v26 }
 0x28c   :  { %996 = vmatpush1.bf16.msra.mxu1 %v3571_v27 }
 0x28d   :  { %997 = vmatprep.subr.bf16.mxu1 %v3578_v28 }
 0x290   :  { %998 = vmatpush1.bf16.msra.mxu1 %v3583_v29 }
 0x291   :  { %1010 = vmatprep.subr.bf16.mxu1 %v3590_v42  ;;  %v3653_v42 = vld [vmem:[%s4339_s5 + $0x100] ss:$8 sps:$4 sm:$0xff]  }
 0x292   :  { %4410 = vst [vmem:[#allocation21_spill] sm:$0xff] %v3653_v42 }
 0x326   :  { %v568_v30 = vpop.f32.mrb[8].mxu1 }
 0x327   :  { %v2572_v31 = vpop.f32.mrb[9].mxu1  ;;  %v577_v32 = vrot.slane %v568_v30, 1  ;;  %v586_v33 = vrot.slane %v568_v30, 2  ;;  %v595_v34 = vrot.slane %v568_v30, 3  ;;  %v604_v35 = vrot.slane %v568_v30, 4 }
 0x328   :  { %v571_v36 = vpop.f32.mrb[10].mxu1 }
 0x329   :  { %v2573_v9 = vpop.f32.mrb[11].mxu1  ;;  %v587_v37 = vrot.slane %v571_v36, 2  ;;  %v578_v38 = vrot.slane %v571_v36, 1  ;;  %v605_v39 = vrot.slane %v571_v36, 4  ;;  %v596_v41 = vrot.slane %v571_v36, 3 }
 0x32b   :  { %v588_v43 = vsel %vm73_vm3, %v586_v33, %v587_v37  ;;  %v579_v44 = vsel %vm77_vm1, %v577_v32, %v578_v38  ;;  %v606_v45 = vsel %vm136_vm4, %v604_v35, %v605_v39  ;;  %v597_v46 = vsel %vm116_vm2, %v595_v34, %v596_v41  ;;  %v3604_v32 = vld [vmem:[%s4342_s8] sm:$0xff]   ;;  %v3610_v33 = vld [vmem:[%s4342_s8 + $0x8] sm:$0xff]   ;;  %v3624_v34 = vld [vmem:[%s4342_s8 + $0x18] sm:$0xff]  }
 0x32c   :  { %v2708_v47 = vpack.i.bf16 %v587_v37, %v588_v43  ;;  %v2703_v31 = vpack.i.bf16 %v578_v38, %v579_v44  ;;  %v2718_v9 = vpack.i.bf16 %v605_v39, %v606_v45  ;;  %v2713_v2 = vpack.i.bf16 %v596_v41, %v597_v46  ;;  %1145 = vmatpush1.bf16.msra.mxu0 %v3604_v32  ;;  %v3631_v35 = vld [vmem:[%s4342_s8 + $0x20] sm:$0xff]  }
 0x32d   :  { %1146 = vmatprep.subr.bf16.mxu0 %v4352_v58 }
 0x32e   :  { %2709 = vrot.lane.b32.xlu1 %v2708_v47, %s3069_s18  ;;  %2704 = vrot.lane.b32.xlu0 %v2703_v31, %s3063_s22 }
 0x330   :  { %1147 = vmatpush1.bf16.msra.mxu0 %v3610_v33 }
 0x331   :  { %1148 = vmatprep.subr.bf16.mxu0 %v4352_v58 }
 0x332   :  { %2719 = vrot.lane.b32.xlu1 %v2718_v9, %s3070_s19  ;;  %2714 = vrot.lane.b32.xlu0 %v2713_v2, %s3071_s20  ;;  %v3617_v2 = vld [vmem:[%s4342_s8 + $0x10] sm:$0xff]  }
 0x334   :  { %1149 = vmatpush1.bf16.msra.mxu0 %v3617_v2 }
 0x335   :  { %1150 = vmatprep.subr.bf16.mxu0 %v4352_v58 }
 0x338   :  { %1151 = vmatpush1.bf16.msra.mxu0 %v3624_v34 }
 0x339   :  { %1152 = vmatprep.subr.bf16.mxu0 %v4352_v58 }
 0x33c   :  { %1153 = vmatpush1.bf16.msra.mxu0 %v3631_v35 }
 0x33d   :  { %1154 = vmatprep.subr.bf16.mxu0 %v4352_v58 }
 0x3a0   :  { %v2710_v37 = vpop.permute.xlu1 %2709  ;;  %v2705_v38 = vpop.permute.xlu0 %2704 }
 0x3a1   :  { %v2707_v39 = vunpack.i.h.bf16 %v2705_v38  ;;  %v2706_v41 = vunpack.i.l.bf16 %v2705_v38  ;;  %v2711_v43 = vunpack.i.l.bf16 %v2710_v37  ;;  %v2712_v44 = vunpack.i.h.bf16 %v2710_v37 }
 0x3a3   :  { %v614_v45 = vsel %vm166_vm7, %v571_v36, %v2707_v39  ;;  %v613_v46 = vsel %vm166_vm7, %v568_v30, %v2706_v41  ;;  %v615_v7 = vsel %vm462_vm10, %v2706_v41, %v2711_v43  ;;  %v616_v38 = vsel %vm462_vm10, %v2707_v39, %v2712_v44  ;;  %v3658_v41 = vld [vmem:[%s4339_s5 + $0x114] ss:$8 sps:$4 sm:$0xff]   ;;  %v3671_v43 = vld [vmem:[%s4339_s5 + $0x124] ss:$8 sps:$4 sm:$0xff]   ;;  %v3677_v44 = vld [vmem:[%s4339_s5 + $0x120] ss:$8 sps:$4 sm:$0xff]  }
 0x3a4   :  { %v623_v47 = vpack.c.bf16 %v614_v45, %v613_v46  ;;  %v3638_v31 = vpop.permute.xlu1 %2719  ;;  %v3640_v9 = vpop.permute.xlu0 %2714  ;;  %4411 = vst [vmem:[#allocation22_spill] sm:$0xff] %v3658_v41  ;;  %4413 = vst [vmem:[#allocation24_spill] sm:$0xff] %v3671_v43 }
 0x3a5   :  { %v2717_v0 = vunpack.i.h.bf16 %v3640_v9  ;;  %v2716_v58 = vunpack.i.l.bf16 %v3640_v9  ;;  %v2722_v37 = vunpack.i.h.bf16 %v3638_v31  ;;  %v2721_v36 = vunpack.i.l.bf16 %v3638_v31  ;;  %4414 = vst [vmem:[#allocation25_spill] sm:$0xff] %v3677_v44  ;;  %v3689_v31 = vld [vmem:[%s4339_s5 + $0x130] ss:$8 sps:$4 sm:$0xff]   ;;  %v3695_v9 = vld [vmem:[%s4339_s5 + $0x144] ss:$8 sps:$4 sm:$0xff]  }
 0x3a6   :  { %4416 = vst [vmem:[#allocation27_spill] sm:$0xff] %v3689_v31  ;;  %4417 = vst [vmem:[#allocation28_spill] sm:$0xff] %v3695_v9 }
 0x3a7   :  { %v618_v30 = vsel %vm617_vm12, %v615_v7, %v2716_v58  ;;  %v619_v45 = vsel %vm617_vm12, %v616_v38, %v2717_v0  ;;  %v626_v39 = vpack.c.bf16 %v2722_v37, %v2721_v36  ;;  %v3665_v7 = vld [vmem:[%s4339_s5 + $0x110] ss:$8 sps:$4 sm:$0xff]   ;;  %v3701_v38 = vld [vmem:[%s4339_s5 + $0x140] ss:$8 sps:$4 sm:$0xff]  }
 0x3a8   :  { %v624_v46 = vpack.c.bf16 %v619_v45, %v618_v30  ;;  %4412 = vst [vmem:[#allocation23_spill] sm:$0xff] %v3665_v7  ;;  %4418 = vst [vmem:[#allocation29_spill] sm:$0xff] %v3701_v38  ;;  %v3707_v30 = vld [vmem:[%s4339_s5 + $0x154] ss:$8 sps:$4 sm:$0xff]   ;;  %v3713_v45 = vld [vmem:[%s4339_s5 + $0x150] ss:$8 sps:$4 sm:$0xff]  }
 0x3a9   :  { %4419 = vst [vmem:[#allocation30_spill] sm:$0xff] %v3707_v30  ;;  %4420 = vst [vmem:[#allocation31_spill] sm:$0xff] %v3713_v45 }
 0x3aa   :  { %999 = vmatprep.mubr.bf16.mxu1 %v624_v46  ;;  %v3719_v46 = vld [vmem:[%s4339_s5 + $0x164] ss:$8 sps:$4 sm:$0xff]  }
 0x3ab   :  { %1000 = vmatmul.mubr.bf16.vlgmr.msra.gmra.mrb[12].mxu1 %v623_v47  ;;  %v3683_v47 = vld [vmem:[%s4339_s5 + $0x134] ss:$8 sps:$4 sm:$0xff]   ;;  %4421 = vst [vmem:[#allocation32_spill] sm:$0xff] %v3719_v46 }
 0x3ac   :  { %1011 = vmatpush1.bf16.msra.mxu1 %v3653_v42  ;;  %2444 = vmatprep.mubr.msk.bf16.mxu1 %vm957_vm13, %v626_v39  ;;  %4415 = vst [vmem:[#allocation26_spill] sm:$0xff] %v3683_v47  ;;  %v3725_v39 = vld [vmem:[%s4339_s5 + $0x160] ss:$8 sps:$4 sm:$0xff]  }
 0x3ad   :  { %1012 = vmatprep.subr.bf16.mxu1 %v3658_v41  ;;  %4422 = vst [vmem:[#allocation33_spill] sm:$0xff] %v3725_v39 }
 0x3b0   :  { %1013 = vmatpush1.bf16.msra.mxu1 %v3665_v7 }
 0x3b1   :  { %1014 = vmatprep.subr.bf16.mxu1 %v3671_v43  ;;  %v2460_v43 = vld [vmem:[%s4334_s0 + $0x38] sm:$0xf] }
 0x3b2   :  { %v1269_v29 = vrot.slane %v2460_v43, 6 }
 0x3b4   :  { %1015 = vmatpush1.bf16.msra.mxu1 %v3677_v44 }
 0x3b5   :  { %1016 = vmatprep.subr.bf16.mxu1 %v3683_v47  ;;  %v621_v47 = vsel %vm620_vm14, %v2716_v58, %v2721_v36  ;;  %v3791_v58 = vld [vmem:[%s4342_s8 + $0x30] sm:$0xff]   ;;  %v3811_v36 = vld [vmem:[%s4342_s8 + $0x48] sm:$0xff]  }
 0x3b8   :  { %1017 = vmatpush1.bf16.msra.mxu1 %v3689_v31 }
 0x3b9   :  { %1018 = vmatprep.subr.bf16.mxu1 %v3695_v9 }
 0x3bc   :  { %1019 = vmatpush1.bf16.msra.mxu1 %v3701_v38  ;;  %v3731_v38 = vld [vmem:[%s4339_s5 + $0x174] ss:$8 sps:$4 sm:$0xff]  }
 0x3bd   :  { %1020 = vmatprep.subr.bf16.mxu1 %v3707_v30  ;;  %4423 = vst [vmem:[#allocation34_spill] sm:$0xff] %v3731_v38  ;;  %v3737_v30 = vld [vmem:[%s4339_s5 + $0x170] ss:$8 sps:$4 sm:$0xff]  }
 0x3be   :  { %4424 = vst [vmem:[#allocation35_spill] sm:$0xff] %v3737_v30 }
 0x3c0   :  { %1021 = vmatpush1.bf16.msra.mxu1 %v3713_v45  ;;  %v3743_v45 = vld [vmem:[%s4339_s5 + $0x184] ss:$8 sps:$4 sm:$0xff]  }
 0x3c1   :  { %1022 = vmatprep.subr.bf16.mxu1 %v3719_v46  ;;  %4425 = vst [vmem:[#allocation36_spill] sm:$0xff] %v3743_v45  ;;  %v3749_v46 = vld [vmem:[%s4339_s5 + $0x180] ss:$8 sps:$4 sm:$0xff]  }
 0x3c2   :  { %4426 = vst [vmem:[#allocation37_spill] sm:$0xff] %v3749_v46 }
 0x3c4   :  { %1023 = vmatpush1.bf16.msra.mxu1 %v3725_v39  ;;  %v3755_v39 = vld [vmem:[%s4339_s5 + $0x194] ss:$8 sps:$4 sm:$0xff]  }
 0x3c5   :  { %1024 = vmatprep.subr.bf16.mxu1 %v3731_v38  ;;  %4427 = vst [vmem:[#allocation38_spill] sm:$0xff] %v3755_v39  ;;  %v679_v38 = vld [vmem:[%s4339_s5 + $0x1a0] sm:$0x33] }
 0x3c6   :  { %v3767_v9 = vcombine.high %v679_v38, %v679_v38 }
 0x3c8   :  { %1025 = vmatpush1.bf16.msra.mxu1 %v3737_v30  ;;  %v3764_v30 = vld [vmem:[%s4339_s5 + $0x190] ss:$8 sps:$4 sm:$0xff]   ;;  %4429 = vst [vmem:[#allocation40_spill] sm:$0xff] %v3767_v9 }
 0x3c9   :  { %1026 = vmatprep.subr.bf16.mxu1 %v3743_v45  ;;  %4428 = vst [vmem:[#allocation39_spill] sm:$0xff] %v3764_v30  ;;  %v2441_v45 = vcombine.low %v679_v38, %v679_v38  ;;  %v3784_v38 = vld [vmem:[%s4342_s8 + $0x28] sm:$0xff]  }
 0x3ca   :  { %1155 = vmatpush1.bf16.msra.mxu0 %v3784_v38 }
 0x3cb   :  { %v3773_v31 = vsel %vm60_vm0, %v2441_v45, 0  ;;  %v4432_v45 = vmov 0  }
 0x3cc   :  { %1027 = vmatpush1.bf16.msra.mxu1 %v3749_v46  ;;  %4430 = vst [vmem:[#allocation41_spill] sm:$0xff] %v3773_v31  ;;  %v622_v46 = vsel %vm620_vm14, %v2717_v0, %v2722_v37  ;;  %1156 = vmatprep.subr.bf16.mxu0 %v4432_v45  ;;  %v3798_v0 = vld [vmem:[%s4342_s8 + $0x38] sm:$0xff]   ;;  %v3804_v37 = vld [vmem:[%s4342_s8 + $0x40] sm:$0xff]  }
 0x3cd   :  { %1028 = vmatprep.subr.bf16.mxu1 %v3755_v39  ;;  %v625_v44 = vpack.c.bf16 %v622_v46, %v621_v47  ;;  %v4431_v39 = vmov 0.0   ;;  %v2458_v47 = vld [vmem:[%s4334_s0 + $0x28] sm:$0xff]  ;;  %v2459_v46 = vld [vmem:[%s4334_s0 + $0x30] sm:$0xff] }
 0x3ce   :  { %1157 = vmatpush1.bf16.msra.mxu0 %v3791_v58 }
 0x3cf   :  { %1158 = vmatprep.subr.bf16.mxu0 %v4432_v45 }
 0x3d0   :  { %1029 = vmatpush1.bf16.msra.mxu1 %v3764_v30  ;;  %v1267_v30 = vrot.slane %v2459_v46, 6 }
 0x3d1   :  { %2443 = vmatprep.subr.msk.bf16.mxu1 %vm60_vm0, %v3767_v9  ;;  %v1265_v9 = vrot.slane %v2458_v47, 6 }
 0x3d2   :  { %1159 = vmatpush1.bf16.msra.mxu0 %v3798_v0  ;;  %v1270_v15 = vsel %vm60_vm0, %v1267_v30, %v1269_v29 }
 0x3d3   :  { %1160 = vmatprep.subr.bf16.mxu0 %v4432_v45  ;;  %v3832_v41 = vsel %vm60_vm0, %v1265_v9, %v1267_v30 }
 0x3d4   :  { %1031 = vmatpush1.bf16.msra.mxu1 %v3773_v31  ;;  %v1282_v47 = vrot.slane %v3832_v41, 1  ;;  %v1301_v26 = vrot.slane %v3832_v41, 2  ;;  %v1320_v24 = vrot.slane %v3832_v41, 3 }
 0x3d5   :  { %2580 = vmatprep.subr.bf16.mxu1 %v4431_v39 }
 0x3d6   :  { %1161 = vmatpush1.bf16.msra.mxu0 %v3804_v37 }
 0x3d7   :  { %1043 = vmatmul.mubr.bf16.vlgmr.msra.gmra.mrb[12].mxu1 %v625_v44  ;;  %1162 = vmatprep.subr.bf16.mxu0 %v4432_v45  ;;  %v2457_v44 = vld [vmem:[%s4334_s0 + $0x20] sm:$0xff] }
 0x3d8   :  { %2584 = vmatprep.mubr.msk.bf16.mxu1 %vm3068_vm11, %v4431_v39  ;;  %v1264_v31 = vrot.slane %v2457_v44, 6 }
 0x3da   :  { %1163 = vmatpush1.bf16.msra.mxu0 %v3811_v36  ;;  %v3829_v7 = vsel %vm60_vm0, %v1264_v31, %v1265_v9  ;;  %v3835_v42 = vsel %vm60_vm0, 0.0, %v1264_v31 }
 0x3db   :  { %2574 = vmatprep.subr.bf16.mxu0 %v4431_v39  ;;  %v1279_v28 = vrot.slane %v3835_v42, 1  ;;  %v1280_v44 = vrot.slane %v3829_v7, 1  ;;  %v1298_v46 = vrot.slane %v3835_v42, 2  ;;  %v1299_v27 = vrot.slane %v3829_v7, 2 }
 0x3dc   :  { %v1317_v25 = vrot.slane %v3835_v42, 3  ;;  %v1318_v9 = vrot.slane %v3829_v7, 3  ;;  %v1336_v23 = vrot.slane %v3835_v42, 4  ;;  %v1337_v16 = vrot.slane %v3829_v7, 4 }
 0x3dd   :  { %v1281_v31 = vsel %vm77_vm1, %v1279_v28, %v1280_v44  ;;  %v1283_v43 = vsel %vm77_vm1, %v1280_v44, %v1282_v47  ;;  %v1300_v21 = vsel %vm73_vm3, %v1298_v46, %v1299_v27  ;;  %v1302_v20 = vsel %vm73_vm3, %v1299_v27, %v1301_v26 }
 0x3de   :  { %v2723_v22 = vpack.i.bf16 %v1283_v43, %v1281_v31  ;;  %v1319_v19 = vsel %vm116_vm2, %v1317_v25, %v1318_v9  ;;  %v2728_v18 = vpack.i.bf16 %v1302_v20, %v1300_v21  ;;  %v1321_v17 = vsel %vm116_vm2, %v1318_v9, %v1320_v24 }
 0x3df   :  { %v1339_v28 = vrot.slane %v3832_v41, 4  ;;  %v2733_v44 = vpack.i.bf16 %v1321_v17, %v1319_v19  ;;  %v1338_v46 = vsel %vm136_vm4, %v1336_v23, %v1337_v16  ;;  %v3861_v25 = vsel %vm73_vm3, %v1270_v15, 0.0 }
 0x3e0   :  { %2724 = vrot.lane.b32.xlu0 %v2723_v22, %s3062_s21  ;;  %2729 = vrot.lane.b32.xlu1 %v2728_v18, %s3064_s27  ;;  %v1284_v21 = vrot.slane %v3861_v25, 1  ;;  %v1303_v9 = vrot.slane %v3861_v25, 2  ;;  %v1322_v31 = vrot.slane %v3861_v25, 3  ;;  %v1341_v17 = vrot.slane %v3861_v25, 4 }
 0x3e1   :  { %v1340_v27 = vsel %vm136_vm4, %v1337_v16, %v1339_v28 }
 0x3e2   :  { %v2738_v20 = vpack.i.bf16 %v1340_v27, %v1338_v46  ;;  %v1285_v18 = vsel %vm77_vm1, %v1282_v47, %v1284_v21  ;;  %v1304_v19 = vsel %vm73_vm3, %v1301_v26, %v1303_v9  ;;  %v1323_v22 = vsel %vm116_vm2, %v1320_v24, %v1322_v31  ;;  %v680_v26 = vld [vmem:[%s4340_s6] sm:$0x3] }
 0x3e3   :  { %v2743_v16 = vpack.i.bf16 %v1284_v21, %v1285_v18  ;;  %v2748_v15 = vpack.i.bf16 %v1303_v9, %v1304_v19  ;;  %v1342_v23 = vsel %vm136_vm4, %v1339_v28, %v1341_v17  ;;  %v2753_v29 = vpack.i.bf16 %v1322_v31, %v1323_v22 }
 0x3e4   :  { %2734 = vrot.lane.b32.xlu0 %v2733_v44, %s3063_s22  ;;  %2739 = vrot.lane.b32.xlu1 %v2738_v20, %s3065_s28  ;;  %v2758_v30 = vpack.i.bf16 %v1341_v17, %v1342_v23  ;;  %v4433_v47 = vsub.s32 0, %v3358_v63  ;;  %v4434_v24 = vsub.s32 1, %v3358_v63 }
 0x3e6   :  { %v3882_v43 = vrot.slane %v680_v26, %v4433_v47  ;;  %v3886_v28 = vrot.slane %v680_v26, %v4434_v24 }
 0x3e8   :  { %2744 = vrot.lane.b32.xlu0 %v2743_v16, %s3062_s21  ;;  %2749 = vrot.lane.b32.xlu1 %v2748_v15, %s3064_s27  ;;  %s3073_s27 = smov 64  }
 0x3ec   :  { %2754 = vrot.lane.b32.xlu0 %v2753_v29, %s3063_s22  ;;  %2759 = vrot.lane.b32.xlu1 %v2758_v30, %s3065_s28 }
 0x452   :  { %v2730_v23 = vpop.permute.xlu1 %2729 }
 0x456   :  { %v3895_v26 = vpop.permute.xlu1 %2739 }
 0x4aa   :  { %v1044_v44 = vpop.f32.mrb[12].mxu1 }
 0x4ab   :  { %v2634_v46 = vadd.f32 %v1044_v44, %v3882_v43  ;;  %v1046_v27 = vpop.f32.mrb[13].mxu1 }
 0x4ac   :  { %v2635_v20 = vadd.f32 %v1046_v27, %v3886_v28  ;;  %v1048_v21 = vpop.f32.mrb[14].mxu1  ;;  %v2741_v27 = vunpack.i.l.bf16 %v3895_v26 }
 0x4ad   :  { %2979 = vtanh.f32 %v2634_v46  ;;  %v2636_v9 = vadd.f32 %v1048_v21, %v3882_v43  ;;  %v1050_v31 = vpop.f32.mrb[15].mxu1  ;;  %v2742_v46 = vunpack.i.h.bf16 %v3895_v26  ;;  %v3903_v21 = vld [vmem:[%s4341_s7] sm:$0x7] }
 0x4ae   :  { %2981 = vtanh.f32 %v2635_v20  ;;  %v2637_v17 = vadd.f32 %v1050_v31, %v3886_v28  ;;  %v3015_v31 = vld [vmem:[%s4335_s1 + $0x4] ss:$8 sps:$4 sm:$0xff]  }
 0x4af   :  { %2983 = vtanh.f32 %v2636_v9  ;;  %v1372_v9 = vpack.c.bf16 %v2742_v46, %v2741_v27 }
 0x4b0   :  { %2985 = vtanh.f32 %v2637_v17  ;;  %v3016_v17 = vld [vmem:[%s4335_s1] ss:$8 sps:$4 sm:$0xff]  }
 0x4b7   :  { %v2980_v18 = vpop.eup %2979 }
 0x4b8   :  { %v2982_v63 = vpop.eup %2981 }
 0x4b9   :  { %v2984_v19 = vpop.eup %2983 }
 0x4ba   :  { %v2986_v16 = vpop.eup %2985  ;;  %v1058_v15 = vpack.c.bf16 %v2984_v19, %v2980_v18  ;;  %v3017_v18 = vld [vmem:[%s4335_s1 + $0x14] ss:$8 sps:$4 sm:$0xff]   ;;  %v3019_v19 = vld [vmem:[%s4335_s1 + $0x24] ss:$8 sps:$4 sm:$0xff]  }
 0x4bb   :  { %v1059_v22 = vpack.c.bf16 %v2986_v16, %v2982_v63  ;;  %v3018_v63 = vld [vmem:[%s4335_s1 + $0x10] ss:$8 sps:$4 sm:$0xff]   ;;  %v3020_v16 = vld [vmem:[%s4335_s1 + $0x20] ss:$8 sps:$4 sm:$0xff]  }
 0x4bd   :  { %2455 = vmatprep.mubr.msk.bf16.mxu0 %vm4393_vm15, %v1059_v22  ;;  %vm1186_vm15 = vcmask 80896   ;;  %v2725_v22 = vpop.permute.xlu0 %2724 }
 0x4be   :  { %1177 = vmatmul.mubr.bf16.vlgmr.msra.gmra.mrb[8].mxu0 %v1058_v15  ;;  %v3021_v15 = vld [vmem:[%s4335_s1 + $0x34] ss:$8 sps:$4 sm:$0xff]  }
 0x4bf   :  { %2576 = vmatprep.mubr.msk.bf16.mxu0 %vm3068_vm11, %v4431_v39 }
 0x591   :  { %v1178_v29 = vpop.f32.mrb[8].mxu0 }
 0x592   :  { %v1180_v30 = vpop.f32.mrb[9].mxu0 }
 0x593   :  { %v1181_v47 = vpop.f32.mrb[10].mxu0  ;;  %v3023_v30 = vld [vmem:[%s4335_s1 + $0x44] ss:$8 sps:$4 sm:$0xff]  }
 0x594   :  { %v1185_v24 = vpack.c.bf16 %v1181_v47, %v1178_v29  ;;  %v1183_v44 = vpop.f32.mrb[11].mxu0  ;;  %v3022_v29 = vld [vmem:[%s4335_s1 + $0x30] ss:$8 sps:$4 sm:$0xff]   ;;  %v3024_v47 = vld [vmem:[%s4335_s1 + $0x40] ss:$8 sps:$4 sm:$0xff]  }
 0x595   :  { %v3025_v44 = vld [vmem:[%s4335_s1 + $0x54] ss:$8 sps:$4 sm:$0xff]  }
 0x596   :  { %v1191_v20 = vsel %vm116_vm2, %v1185_v24, 0  ;;  %v2735_v24 = vpop.permute.xlu0 %2734 }
 0x597   :  { %2575 = vmatpush3.bf16.msra.mxu0 %v1191_v20  ;;  %v2727_v20 = vunpack.i.h.bf16 %v2725_v22 }
 0x598   :  { %1381 = vmatprep.subr.bf16.mxu0 %v3015_v31  ;;  %v3026_v31 = vld [vmem:[%s4335_s1 + $0x50] ss:$8 sps:$4 sm:$0xff]  }
 0x59a   :  { %2577 = vmatmul.mubr.msk.bf16.vlgmr.msra.gmra.mrb[12].mxu0 %vm1186_vm15, %v3903_v21 }
 0x59b   :  { %1382 = vmatpush1.bf16.msra.mxu0 %v3016_v17  ;;  %2462 = vmatprep.mubr.msk.bf16.mxu0 %vm298_vm9, %v1372_v9  ;;  %v2726_v9 = vunpack.i.l.bf16 %v2725_v22  ;;  %v2732_v17 = vunpack.i.h.bf16 %v2730_v23  ;;  %v2745_v22 = vpop.permute.xlu0 %2744 }
 0x59c   :  { %1383 = vmatprep.subr.bf16.mxu0 %v3017_v18  ;;  %v2731_v18 = vunpack.i.l.bf16 %v2730_v23  ;;  %v2747_v23 = vunpack.i.h.bf16 %v2745_v22 }
 0x59f   :  { %1384 = vmatpush1.bf16.msra.mxu0 %v3018_v63  ;;  %v1356_v63 = vsel %vm156_vm5, %v3829_v7, %v2727_v20  ;;  %v3028_v7 = vld [vmem:[%s4335_s1 + $0x60] ss:$8 sps:$4 sm:$0xff]   ;;  %v2746_v20 = vunpack.i.l.bf16 %v2745_v22  ;;  %v3031_v22 = vld [vmem:[%s4335_s1 + $0x84] ss:$8 sps:$4 sm:$0x3f]  }
 0x5a0   :  { %1385 = vmatprep.subr.bf16.mxu0 %v3019_v19  ;;  %v1355_v19 = vsel %vm156_vm5, %v3835_v42, %v2726_v9  ;;  %v3029_v42 = vld [vmem:[%s4335_s1 + $0x74] ss:$8 sps:$4 sm:$0xff]  }
 0x5a3   :  { %1386 = vmatpush1.bf16.msra.mxu0 %v3020_v16  ;;  %v3027_v16 = vld [vmem:[%s4335_s1 + $0x64] ss:$8 sps:$4 sm:$0xff]  }
 0x5a4   :  { %1387 = vmatprep.subr.bf16.mxu0 %v3021_v15  ;;  %v2750_v15 = vpop.permute.xlu1 %2749 }
 0x5a7   :  { %1388 = vmatpush1.bf16.msra.mxu0 %v3022_v29  ;;  %v2737_v29 = vunpack.i.h.bf16 %v2735_v24 }
 0x5a8   :  { %1389 = vmatprep.subr.bf16.mxu0 %v3023_v30  ;;  %v2736_v30 = vunpack.i.l.bf16 %v2735_v24 }
 0x5ab   :  { %1390 = vmatpush1.bf16.msra.mxu0 %v3024_v47  ;;  %v1359_v47 = vsel %vm161_vm6, %v1355_v19, %v2731_v18  ;;  %v2752_v18 = vunpack.i.h.bf16 %v2750_v15  ;;  %v2755_v19 = vpop.permute.xlu0 %2754 }
 0x5ac   :  { %1391 = vmatprep.subr.bf16.mxu0 %v3025_v44  ;;  %v1360_v44 = vsel %vm161_vm6, %v1356_v63, %v2732_v17  ;;  %v1363_v9 = vsel %vm166_vm7, %v1359_v47, %v2736_v30  ;;  %v3030_v17 = vld [vmem:[%s4335_s1 + $0x70] ss:$8 sps:$4 sm:$0xff]   ;;  %v2751_v63 = vunpack.i.l.bf16 %v2750_v15  ;;  %s3072_s1 = smov 32  }
 0x5ad   :  { %v1364_v24 = vsel %vm166_vm7, %v1360_v44, %v2737_v29  ;;  %v1367_v29 = vsel %vm171_vm8, %v1363_v9, %v2741_v27  ;;  %v2756_v44 = vunpack.i.l.bf16 %v2755_v19 }
 0x5ae   :  { %v1368_v15 = vsel %vm171_vm8, %v1364_v24, %v2742_v46  ;;  %v3032_v46 = vld [vmem:[%s4338_s4] sm:$0xff]   ;;  %v3033_v24 = vld [vmem:[%s4338_s4 + $0x8] sm:$0xff]  }
 0x5af   :  { %1392 = vmatpush1.bf16.msra.mxu0 %v3026_v31  ;;  %v2760_v31 = vpop.permute.xlu1 %2759 }
 0x5b0   :  { %1393 = vmatprep.subr.bf16.mxu0 %v3027_v16  ;;  %v1358_v16 = vsel %vm156_vm5, %v3861_v25, %v2747_v23  ;;  %v2762_v30 = vunpack.i.h.bf16 %v2760_v31  ;;  %v2761_v47 = vunpack.i.l.bf16 %v2760_v31  ;;  %v2757_v25 = vunpack.i.h.bf16 %v2755_v19  ;;  %v3037_v19 = vld [vmem:[%s4338_s4 + $0x28] sm:$0xff]  }
 0x5b2   :  { %v1374_v23 = vpack.c.bf16 %v2762_v30, %v2761_v47 }
 0x5b3   :  { %1394 = vmatpush1.bf16.msra.mxu0 %v3028_v7  ;;  %v1357_v7 = vsel %vm156_vm5, %v3832_v41, %v2746_v20  ;;  %v1371_v20 = vpack.c.bf16 %v1368_v15, %v1367_v29 }
 0x5b4   :  { %1395 = vmatprep.subr.bf16.mxu0 %v3029_v42  ;;  %v1361_v41 = vsel %vm161_vm6, %v1357_v7, %v2751_v63  ;;  %v1362_v42 = vsel %vm161_vm6, %v1358_v16, %v2752_v18  ;;  %v3035_v18 = vld [vmem:[%s4338_s4 + $0x18] sm:$0xff]   ;;  %v3036_v63 = vld [vmem:[%s4338_s4 + $0x20] sm:$0xff]  }
 0x5b5   :  { %v1365_v27 = vsel %vm166_vm7, %v1361_v41, %v2756_v44  ;;  %v1366_v26 = vsel %vm166_vm7, %v1362_v42, %v2757_v25 }
 0x5b6   :  { %v1370_v9 = vsel %vm171_vm8, %v1366_v26, %v2762_v30 }
 0x5b7   :  { %1396 = vmatpush1.bf16.msra.mxu0 %v3030_v17  ;;  %v3034_v17 = vld [vmem:[%s4338_s4 + $0x10] sm:$0xff]  }
 0x5b8   :  { %2461 = vmatprep.subr.msk.bf16.mxu0 %vm73_vm3, %v3031_v22 }
 0x5bb   :  { %1398 = vmatpush1.bf16.msra.mxu0 %v3296_v13  ;;  %v1369_v13 = vsel %vm171_vm8, %v1365_v27, %v2761_v47 }
 0x5bc   :  { %1452 = vmatprep.subr.bf16.mxu0 %v4432_v45  ;;  %v1373_v31 = vpack.c.bf16 %v1370_v9, %v1369_v13 }
 0x5be   :  { %1414 = vmatmul.mubr.bf16.vlgmr.msra.gmra.mrb[16].mxu0 %v1371_v20 }
 0x5bf   :  { %2463 = vmatprep.mubr.msk.bf16.mxu0 %vm298_vm9, %v1374_v23  ;;  %1453 = vmatpush1.bf16.msra.mxu0 %v3032_v46 }
 0x5c0   :  { %1454 = vmatprep.subr.bf16.mxu0 %v4432_v45 }
 0x5c3   :  { %1455 = vmatpush1.bf16.msra.mxu0 %v3033_v24 }
 0x5c4   :  { %1456 = vmatprep.subr.bf16.mxu0 %v4432_v45 }
 0x5c6   :  { %1424 = vmatmul.mubr.bf16.gmra.mrb[20].mxu0 %v1373_v31 }
 0x5c7   :  { %1457 = vmatpush1.bf16.msra.mxu0 %v3034_v17 }
 0x5c8   :  { %1458 = vmatprep.subr.bf16.mxu0 %v4432_v45 }
 0x5cb   :  { %1459 = vmatpush1.bf16.msra.mxu0 %v3035_v18 }
 0x5cc   :  { %1460 = vmatprep.subr.bf16.mxu0 %v4432_v45 }
 0x5cf   :  { %1461 = vmatpush1.bf16.msra.mxu0 %v3036_v63 }
 0x5d0   :  { %1462 = vmatprep.subr.bf16.mxu0 %v4432_v45 }
 0x5d3   :  { %1463 = vmatpush1.bf16.msra.mxu0 %v3037_v19 }
 0x5d4   :  { %1464 = vmatprep.subr.bf16.mxu0 %v4432_v45 }
 0x5d7   :  { %1465 = vmatpush1.bf16.msra.mxu0 %v3326_v55 }
 0x5d8   :  { %1466 = vmatprep.subr.bf16.mxu0 %v4432_v45 }
 0x5db   :  { %1467 = vmatpush1.bf16.msra.mxu0 %v3333_v56 }
 0x5dc   :  { %1468 = vmatprep.subr.bf16.mxu0 %v4432_v45 }
 0x5df   :  { %1469 = vmatpush1.bf16.msra.mxu0 %v3340_v57 }
 0x5e0   :  { %1470 = vmatprep.subr.bf16.mxu0 %v4432_v45 }
 0x5e3   :  { %1471 = vmatpush1.bf16.msra.mxu0 %v3347_v59 }
 0x5e4   :  { %1472 = vmatprep.subr.bf16.mxu0 %v4432_v45 }
 0x5e7   :  { %1473 = vmatpush1.bf16.msra.mxu0 %v3355_v61 }
 0x5e8   :  { %1695 = vmatprep.subr.bf16.mxu0 %v4432_v45 }
 0x66d   :  { %v4025_v16 = vpop.f32.mrb[12].mxu0 }
 0x66e   :  { %v2578_v55 = vpop.f32.mrb[13].mxu0 }
 0x66f   :  { %v1230_v7 = vpop.f32.mrb[14].mxu0 }
 0x670   :  { %v2579_v22 = vpop.f32.mrb[15].mxu0 }
 0x691   :  { %v1415_v56 = vpop.f32.mrb[16].mxu0 }
 0x692   :  { %v1416_v29 = vadd.f32 %v1415_v56, %v3367_v3  ;;  %v1417_v15 = vpop.f32.mrb[17].mxu0 }
 0x693   :  { %v1418_v57 = vadd.f32 %v1417_v15, %v3371_v4  ;;  %v1419_v30 = vpop.f32.mrb[18].mxu0 }
 0x694   :  { %2987 = vtanh.f32 %v1416_v29  ;;  %v1420_v59 = vadd.f32 %v1419_v30, %v3367_v3  ;;  %v1421_v47 = vpop.f32.mrb[19].mxu0 }
 0x695   :  { %2989 = vtanh.f32 %v1418_v57  ;;  %v1422_v61 = vadd.f32 %v1421_v47, %v3371_v4 }
 0x696   :  { %2991 = vtanh.f32 %v1420_v59 }
 0x697   :  { %2993 = vtanh.f32 %v1422_v61 }
 0x699   :  { %v1425_v25 = vpop.f32.mrb[20].mxu0 }
 0x69a   :  { %v1426_v44 = vadd.f32 %v1425_v25, %v3367_v3  ;;  %v1427_v41 = vpop.f32.mrb[21].mxu0 }
 0x69b   :  { %v1428_v42 = vadd.f32 %v1427_v41, %v3371_v4  ;;  %v1429_v23 = vpop.f32.mrb[22].mxu0 }
 0x69c   :  { %2995 = vtanh.f32 %v1426_v44  ;;  %v1430_v20 = vadd.f32 %v1429_v23, %v3367_v3  ;;  %v1431_v27 = vpop.f32.mrb[23].mxu0 }
 0x69d   :  { %2997 = vtanh.f32 %v1428_v42  ;;  %v1432_v26 = vadd.f32 %v1431_v27, %v3371_v4 }
 0x69e   :  { %v2988_v46 = vpop.eup %2987  ;;  %2999 = vtanh.f32 %v1430_v20 }
 0x69f   :  { %v2990_v13 = vpop.eup %2989  ;;  %3001 = vtanh.f32 %v1432_v26 }
 0x6a0   :  { %v2992_v9 = vpop.eup %2991 }
 0x6a1   :  { %v2994_v24 = vpop.eup %2993  ;;  %v1442_v31 = vpack.c.bf16 %v2992_v9, %v2988_v46 }
 0x6a2   :  { %v1443_v17 = vpack.c.bf16 %v2994_v24, %v2990_v13 }
 0x6a4   :  { %2464 = vmatprep.mubr.msk.bf16.mxu0 %vm462_vm10, %v1443_v17 }
 0x6a5   :  { %1485 = vmatmul.mubr.bf16.vlgmr.msra.gmra.mrb[24].mxu0 %v1442_v31 }
 0x6a6   :  { %v2996_v18 = vpop.eup %2995  ;;  %1696 = vmatpush1.bf16.msra.mxu0 %v3604_v32 }
 0x6a7   :  { %v2998_v63 = vpop.eup %2997  ;;  %1697 = vmatprep.subr.bf16.mxu0 %v4432_v45 }
 0x6a8   :  { %v3000_v3 = vpop.eup %2999 }
 0x6a9   :  { %v3002_v19 = vpop.eup %3001  ;;  %v1444_v4 = vpack.c.bf16 %v3000_v3, %v2996_v18 }
 0x6aa   :  { %v1445_v55 = vpack.c.bf16 %v3002_v19, %v2998_v63  ;;  %1698 = vmatpush1.bf16.msra.mxu0 %v3610_v33 }
 0x6ab   :  { %1699 = vmatprep.subr.bf16.mxu0 %v4432_v45 }
 0x6ac   :  { %2465 = vmatprep.mubr.msk.bf16.mxu0 %vm462_vm10, %v1445_v55 }
 0x6ad   :  { %1493 = vmatmul.mubr.bf16.gmra.mrb[28].mxu0 %v1444_v4 }
 0x6ae   :  { %1700 = vmatpush1.bf16.msra.mxu0 %v3617_v2 }
 0x6af   :  { %1701 = vmatprep.subr.bf16.mxu0 %v4432_v45 }
 0x6b2   :  { %1702 = vmatpush1.bf16.msra.mxu0 %v3624_v34 }
 0x6b3   :  { %1703 = vmatprep.subr.bf16.mxu0 %v4432_v45 }
 0x6b6   :  { %1704 = vmatpush1.bf16.msra.mxu0 %v3631_v35 }
 0x6b7   :  { %1705 = vmatprep.subr.bf16.mxu0 %v4432_v45 }
 0x6ba   :  { %1706 = vmatpush1.bf16.msra.mxu0 %v3784_v38 }
 0x6bb   :  { %1707 = vmatprep.subr.bf16.mxu0 %v4432_v45 }
 0x6be   :  { %1708 = vmatpush1.bf16.msra.mxu0 %v3791_v58 }
 0x6bf   :  { %1709 = vmatprep.subr.bf16.mxu0 %v4432_v45 }
 0x6c2   :  { %1710 = vmatpush1.bf16.msra.mxu0 %v3798_v0 }
 0x6c3   :  { %1711 = vmatprep.subr.bf16.mxu0 %v4432_v45 }
 0x6c6   :  { %1712 = vmatpush1.bf16.msra.mxu0 %v3804_v37 }
 0x6c7   :  { %1713 = vmatprep.subr.bf16.mxu0 %v4432_v45 }
 0x6ca   :  { %1714 = vmatpush1.bf16.msra.mxu0 %v3811_v36 }
 0x6cb   :  { %2588 = vmatprep.subr.bf16.mxu0 %v4431_v39 }
 0x778   :  { %v1486_v32 = vpop.f32.mrb[24].mxu0 }
 0x779   :  { %v1488_v33 = vpop.f32.mrb[25].mxu0 }
 0x77a   :  { %v1489_v2 = vpop.f32.mrb[26].mxu0 }
 0x77b   :  { %v1501_v34 = vpack.c.bf16 %v1489_v2, %v1486_v32  ;;  %v1491_v35 = vpop.f32.mrb[27].mxu0 }
 0x77d   :  { %2581 = vmatpush3.bf16.msra.mxu1 %v1501_v34 }
 0x77e   :  { %2582 = vmatprep.subr.bf16.mxu1 %v4431_v39 }
 0x780   :  { %v1494_v38 = vpop.f32.mrb[28].mxu0 }
 0x781   :  { %v1496_v58 = vpop.f32.mrb[29].mxu0 }
 0x782   :  { %v1497_v0 = vpop.f32.mrb[30].mxu0 }
 0x783   :  { %v1502_v7 = vpack.c.bf16 %v1497_v0, %v1494_v38  ;;  %v1499_v22 = vpop.f32.mrb[31].mxu0 }
 0x785   :  { %v1504_v37 = vsel %vm73_vm3, %v1502_v7, 0 }
 0x786   :  { %2583 = vmatpush3.bf16.msra.mxu1 %v1504_v37  ;;  %v4451_v37 = vld [vmem:[#allocation21_spill] sm:$0xff] }
 0x787   :  { %1600 = vmatprep.subr.bf16.mxu1 %v3403_v50  ;;  %v4437_v50 = vld [vmem:[#allocation7_spill] sm:$0xff] }
 0x789   :  { %2585 = vmatmul.mubr.msk.bf16.vlgmr.msra.gmra.mrb[16].mxu1 %vm156_vm5, %v3391_v48  ;;  %v4435_v48 = vld [vmem:[#allocation5_spill] sm:$0xff]  ;;  %vm1253_vm5 = vcmask 523264  }
 0x78a   :  { %1601 = vmatpush1.bf16.msra.mxu1 %v3398_v49  ;;  %v4436_v49 = vld [vmem:[#allocation6_spill] sm:$0xff] }
 0x78b   :  { %1602 = vmatprep.subr.bf16.mxu1 %v3408_v51  ;;  %v4438_v51 = vld [vmem:[#allocation8_spill] sm:$0xff] }
 0x78e   :  { %1603 = vmatpush1.bf16.msra.mxu1 %v3415_v52  ;;  %v4439_v52 = vld [vmem:[#allocation9_spill] sm:$0xff] }
 0x78f   :  { %1604 = vmatprep.subr.bf16.mxu1 %v3421_v53  ;;  %v4440_v53 = vld [vmem:[#allocation10_spill] sm:$0xff] }
 0x792   :  { %1605 = vmatpush1.bf16.msra.mxu1 %v3427_v40  ;;  %v4441_v40 = vld [vmem:[#allocation11_spill] sm:$0xff] }
 0x793   :  { %1606 = vmatprep.subr.bf16.mxu1 %v3433_v8  ;;  %v4442_v8 = vld [vmem:[#allocation12_spill] sm:$0xff] }
 0x796   :  { %1607 = vmatpush1.bf16.msra.mxu1 %v3439_v54  ;;  %v4443_v54 = vld [vmem:[#allocation13_spill] sm:$0xff] }
 0x797   :  { %1608 = vmatprep.subr.bf16.mxu1 %v3445_v60  ;;  %v4444_v60 = vld [vmem:[#allocation14_spill] sm:$0xff] }
 0x79a   :  { %1609 = vmatpush1.bf16.msra.mxu1 %v3451_v62  ;;  %v4445_v62 = vld [vmem:[#allocation15_spill] sm:$0xff] }
 0x79b   :  { %1610 = vmatprep.subr.bf16.mxu1 %v3457_v1  ;;  %v4446_v1 = vld [vmem:[#allocation16_spill] sm:$0xff] }
 0x79e   :  { %1611 = vmatpush1.bf16.msra.mxu1 %v3463_v5  ;;  %v4447_v5 = vld [vmem:[#allocation17_spill] sm:$0xff] }
 0x79f   :  { %1612 = vmatprep.subr.bf16.mxu1 %v3469_v6  ;;  %v4448_v6 = vld [vmem:[#allocation18_spill] sm:$0xff] }
 0x7a2   :  { %1613 = vmatpush1.bf16.msra.mxu1 %v3475_v10  ;;  %v4449_v10 = vld [vmem:[#allocation19_spill] sm:$0xff] }
 0x7a3   :  { %1614 = vmatprep.subr.bf16.mxu1 %v3481_v11  ;;  %v4450_v11 = vld [vmem:[#allocation20_spill] sm:$0xff] }
 0x7a6   :  { %1615 = vmatpush1.bf16.msra.mxu1 %v3487_v12 }
 0x7a7   :  { %1616 = vmatprep.subr.bf16.mxu1 %v3493_v14 }
 0x7aa   :  { %1617 = vmatpush1.bf16.msra.mxu1 %v4435_v48  ;;  %v4452_v48 = vld [vmem:[#allocation22_spill] sm:$0xff] }
 0x7ab   :  { %1618 = vmatprep.subr.bf16.mxu1 %v4436_v49  ;;  %v4453_v49 = vld [vmem:[#allocation23_spill] sm:$0xff] }
 0x7ae   :  { %1619 = vmatpush1.bf16.msra.mxu1 %v4437_v50  ;;  %v4454_v50 = vld [vmem:[#allocation24_spill] sm:$0xff] }
 0x7af   :  { %1620 = vmatprep.subr.bf16.mxu1 %v4438_v51  ;;  %v4455_v51 = vld [vmem:[#allocation25_spill] sm:$0xff] }
 0x7b2   :  { %1621 = vmatpush1.bf16.msra.mxu1 %v4439_v52  ;;  %v4456_v52 = vld [vmem:[#allocation26_spill] sm:$0xff] }
 0x7b3   :  { %1622 = vmatprep.subr.bf16.mxu1 %v4440_v53  ;;  %v4457_v53 = vld [vmem:[#allocation27_spill] sm:$0xff] }
 0x7b6   :  { %1623 = vmatpush1.bf16.msra.mxu1 %v4441_v40  ;;  %v4458_v40 = vld [vmem:[#allocation28_spill] sm:$0xff] }
 0x7b7   :  { %1624 = vmatprep.subr.bf16.mxu1 %v4442_v8  ;;  %v4459_v8 = vld [vmem:[#allocation29_spill] sm:$0xff] }
 0x7ba   :  { %1625 = vmatpush1.bf16.msra.mxu1 %v4443_v54  ;;  %v4460_v54 = vld [vmem:[#allocation30_spill] sm:$0xff] }
 0x7bb   :  { %1626 = vmatprep.subr.bf16.mxu1 %v4444_v60  ;;  %v4461_v60 = vld [vmem:[#allocation31_spill] sm:$0xff] }
 0x7be   :  { %1627 = vmatpush1.bf16.msra.mxu1 %v4445_v62  ;;  %v4462_v62 = vld [vmem:[#allocation32_spill] sm:$0xff] }
 0x7bf   :  { %1628 = vmatprep.subr.bf16.mxu1 %v4446_v1  ;;  %v4463_v1 = vld [vmem:[#allocation33_spill] sm:$0xff] }
 0x7c2   :  { %1629 = vmatpush1.bf16.msra.mxu1 %v4447_v5  ;;  %v4464_v5 = vld [vmem:[#allocation34_spill] sm:$0xff] }
 0x7c3   :  { %1630 = vmatprep.subr.bf16.mxu1 %v4448_v6  ;;  %v4465_v6 = vld [vmem:[#allocation35_spill] sm:$0xff] }
 0x7c6   :  { %1631 = vmatpush1.bf16.msra.mxu1 %v4449_v10  ;;  %v4466_v10 = vld [vmem:[#allocation36_spill] sm:$0xff] }
 0x7c7   :  { %1643 = vmatprep.subr.bf16.mxu1 %v4450_v11  ;;  %v4467_v11 = vld [vmem:[#allocation37_spill] sm:$0xff] }
 0x85c   :  { %v1540_v12 = vpop.f32.mrb[16].mxu1 }
 0x85d   :  { %v2586_v14 = vpop.f32.mrb[17].mxu1  ;;  %v1549_v36 = vrot.slane %v1540_v12, 1  ;;  %v1558_v56 = vrot.slane %v1540_v12, 2  ;;  %v1567_v29 = vrot.slane %v1540_v12, 3  ;;  %v1576_v15 = vrot.slane %v1540_v12, 4 }
 0x85e   :  { %v1543_v57 = vpop.f32.mrb[18].mxu1  ;;  %v4469_v14 = vld [vmem:[#allocation39_spill] sm:$0xff] }
 0x85f   :  { %v2587_v30 = vpop.f32.mrb[19].mxu1  ;;  %v1559_v59 = vrot.slane %v1543_v57, 2  ;;  %v1550_v47 = vrot.slane %v1543_v57, 1  ;;  %v1577_v61 = vrot.slane %v1543_v57, 4  ;;  %v1568_v25 = vrot.slane %v1543_v57, 3 }
 0x861   :  { %v1560_v44 = vsel %vm73_vm3, %v1558_v56, %v1559_v59  ;;  %v1551_v41 = vsel %vm77_vm1, %v1549_v36, %v1550_v47  ;;  %v1578_v42 = vsel %vm136_vm4, %v1576_v15, %v1577_v61  ;;  %v1569_v23 = vsel %vm116_vm2, %v1567_v29, %v1568_v25  ;;  %v4470_v36 = vld [vmem:[#allocation40_spill] sm:$0xff]  ;;  %v4471_v15 = vld [vmem:[#allocation41_spill] sm:$0xff] }
 0x862   :  { %v2768_v20 = vpack.i.bf16 %v1559_v59, %v1560_v44  ;;  %v2763_v27 = vpack.i.bf16 %v1550_v47, %v1551_v41  ;;  %v2778_v26 = vpack.i.bf16 %v1577_v61, %v1578_v42  ;;  %v2773_v46 = vpack.i.bf16 %v1568_v25, %v1569_v23 }
 0x863   :  { %vm2028_vm4 = vcmask 130048  }
 0x864   :  { %2769 = vrot.lane.b32.xlu1 %v2768_v20, %s3069_s18  ;;  %2764 = vrot.lane.b32.xlu0 %v2763_v27, %s3063_s22 }
 0x868   :  { %2779 = vrot.lane.b32.xlu1 %v2778_v26, %s3070_s19  ;;  %2774 = vrot.lane.b32.xlu0 %v2773_v46, %s3071_s20 }
 0x8d6   :  { %v2770_v13 = vpop.permute.xlu1 %2769  ;;  %v2765_v9 = vpop.permute.xlu0 %2764 }
 0x8d7   :  { %v2767_v24 = vunpack.i.h.bf16 %v2765_v9  ;;  %v2766_v31 = vunpack.i.l.bf16 %v2765_v9  ;;  %v2771_v17 = vunpack.i.l.bf16 %v2770_v13  ;;  %v2772_v18 = vunpack.i.h.bf16 %v2770_v13 }
 0x8d9   :  { %v1586_v63 = vsel %vm166_vm7, %v1543_v57, %v2767_v24  ;;  %v1585_v3 = vsel %vm166_vm7, %v1540_v12, %v2766_v31  ;;  %v1587_v2 = vsel %vm462_vm10, %v2766_v31, %v2771_v17  ;;  %v1588_v34 = vsel %vm462_vm10, %v2767_v24, %v2772_v18  ;;  %v4468_v12 = vld [vmem:[#allocation38_spill] sm:$0xff]  ;;  %v2922_v18 = vld [vmem:[%s4343_s9 + $0x40] sm:$0xff]  }
 0x8da   :  { %v1593_v19 = vpack.c.bf16 %v1586_v63, %v1585_v3  ;;  %v2780_v4 = vpop.permute.xlu1 %2779  ;;  %v2775_v55 = vpop.permute.xlu0 %2774  ;;  %v2923_v63 = vld [vmem:[%s4343_s9] sm:$0xff]   ;;  %v2924_v3 = vld [vmem:[%s4343_s9 + $0x48] sm:$0xff]  }
 0x8db   :  { %v2777_v32 = vunpack.i.h.bf16 %v2775_v55  ;;  %v2776_v33 = vunpack.i.l.bf16 %v2775_v55  ;;  %v2782_v35 = vunpack.i.h.bf16 %v2780_v4  ;;  %v2781_v38 = vunpack.i.l.bf16 %v2780_v4  ;;  %v2927_v4 = vld [vmem:[%s4343_s9 + $0x10] sm:$0xff]   ;;  %v2928_v55 = vld [vmem:[%s4343_s9 + $0x58] sm:$0xff]  }
 0x8dd   :  { %v1589_v58 = vsel %vm617_vm12, %v1587_v2, %v2776_v33  ;;  %v1590_v0 = vsel %vm617_vm12, %v1588_v34, %v2777_v32  ;;  %v1596_v22 = vpack.c.bf16 %v2782_v35, %v2781_v38  ;;  %v1592_v56 = vsel %vm620_vm14, %v2777_v32, %v2782_v35  ;;  %v2929_v32 = vld [vmem:[%s4343_s9 + $0x18] sm:$0xff]   ;;  %v2931_v2 = vld [vmem:[%s4343_s9 + $0x20] sm:$0xff]   ;;  %v2932_v34 = vld [vmem:[%s4343_s9 + $0x68] sm:$0xff]  }
 0x8de   :  { %v1594_v7 = vpack.c.bf16 %v1590_v0, %v1589_v58  ;;  %v1591_v29 = vsel %vm620_vm14, %v2776_v33, %v2781_v38  ;;  %v2930_v33 = vld [vmem:[%s4343_s9 + $0x60] sm:$0xff]   ;;  %v2933_v35 = vld [vmem:[%s4343_s9 + $0x28] sm:$0xff]   ;;  %v2934_v38 = vld [vmem:[%s4343_s9 + $0x70] sm:$0xff]  }
 0x8df   :  { %v1595_v57 = vpack.c.bf16 %v1592_v56, %v1591_v29  ;;  %v2935_v58 = vld [vmem:[%s4343_s9 + $0x30] sm:$0xff]   ;;  %v2936_v0 = vld [vmem:[%s4343_s9 + $0x78] sm:$0xff]  }
 0x8e0   :  { %1632 = vmatprep.mubr.bf16.mxu1 %v1594_v7  ;;  %v2937_v7 = vld [vmem:[%s4343_s9 + $0x38] sm:$0xff]  }
 0x8e1   :  { %1633 = vmatmul.mubr.bf16.vlgmr.msra.gmra.mrb[20].mxu1 %v1593_v19  ;;  %v2925_v19 = vld [vmem:[%s4343_s9 + $0x8] sm:$0xff]  }
 0x8e2   :  { %1644 = vmatpush1.bf16.msra.mxu1 %v4451_v37  ;;  %2468 = vmatprep.mubr.msk.bf16.mxu1 %vm957_vm13, %v1596_v22 }
 0x8e3   :  { %1645 = vmatprep.subr.bf16.mxu1 %v4452_v48  ;;  %v1238_v48 = vrot.slane %v4025_v16, 2 }
 0x8e6   :  { %1646 = vmatpush1.bf16.msra.mxu1 %v4453_v49 }
 0x8e7   :  { %1647 = vmatprep.subr.bf16.mxu1 %v4454_v50  ;;  %v1234_v50 = vrot.slane %v4025_v16, 1 }
 0x8ea   :  { %1648 = vmatpush1.bf16.msra.mxu1 %v4455_v51 }
 0x8eb   :  { %1649 = vmatprep.subr.bf16.mxu1 %v4456_v52 }
 0x8ee   :  { %1650 = vmatpush1.bf16.msra.mxu1 %v4457_v53 }
 0x8ef   :  { %1651 = vmatprep.subr.bf16.mxu1 %v4458_v40 }
 0x8f2   :  { %1652 = vmatpush1.bf16.msra.mxu1 %v4459_v8 }
 0x8f3   :  { %1653 = vmatprep.subr.bf16.mxu1 %v4460_v54  ;;  %v1242_v54 = vrot.slane %v4025_v16, 3 }
 0x8f6   :  { %1654 = vmatpush1.bf16.msra.mxu1 %v4461_v60 }
 0x8f7   :  { %1655 = vmatprep.subr.bf16.mxu1 %v4462_v62  ;;  %v1246_v62 = vrot.slane %v4025_v16, 4 }
 0x8fa   :  { %1656 = vmatpush1.bf16.msra.mxu1 %v4463_v1 }
 0x8fb   :  { %1657 = vmatprep.subr.bf16.mxu1 %v4464_v5 }
 0x8fe   :  { %1658 = vmatpush1.bf16.msra.mxu1 %v4465_v6 }
 0x8ff   :  { %1659 = vmatprep.subr.bf16.mxu1 %v4466_v10 }
 0x902   :  { %1660 = vmatpush1.bf16.msra.mxu1 %v4467_v11 }
 0x903   :  { %1661 = vmatprep.subr.bf16.mxu1 %v4468_v12 }
 0x906   :  { %1662 = vmatpush1.bf16.msra.mxu1 %v4469_v14 }
 0x907   :  { %2467 = vmatprep.subr.msk.bf16.mxu1 %vm60_vm0, %v4470_v36  ;;  %vm4472_vm0 = vcmask 261120  }
 0x908   :  { %vm4473_vm1 = vmmov %vm4472_vm0 }
 0x909   :  { %vm4474_vm3 = vmmov %vm4472_vm0 }
 0x90a   :  { %1664 = vmatpush1.bf16.msra.mxu1 %v4471_v15 }
 0x90b   :  { %2594 = vmatprep.subr.bf16.mxu1 %v4431_v39 }
 0x90d   :  { %1676 = vmatmul.mubr.bf16.vlgmr.msra.gmra.mrb[20].mxu1 %v1595_v57 }
 0x90e   :  { %2610 = vmatprep.mubr.msk.bf16.mxu1 %vm3068_vm11, %v4431_v39 }
 0x9e0   :  { %v1677_v30 = vpop.f32.mrb[20].mxu1 }
 0x9e1   :  { %v2638_v59 = vadd.f32 %v1677_v30, %v3882_v43  ;;  %v1679_v47 = vpop.f32.mrb[21].mxu1 }
 0x9e2   :  { %v2639_v61 = vadd.f32 %v1679_v47, %v3886_v28  ;;  %v1681_v25 = vpop.f32.mrb[22].mxu1 }
 0x9e3   :  { %3003 = vtanh.f32 %v2638_v59  ;;  %v2640_v44 = vadd.f32 %v1681_v25, %v3882_v43  ;;  %v1683_v41 = vpop.f32.mrb[23].mxu1 }
 0x9e4   :  { %3005 = vtanh.f32 %v2639_v61  ;;  %v2641_v42 = vadd.f32 %v1683_v41, %v3886_v28 }
 0x9e5   :  { %3007 = vtanh.f32 %v2640_v44 }
 0x9e6   :  { %3009 = vtanh.f32 %v2641_v42 }
 0x9ed   :  { %v3004_v23 = vpop.eup %3003 }
 0x9ee   :  { %v3006_v20 = vpop.eup %3005 }
 0x9ef   :  { %v3008_v27 = vpop.eup %3007 }
 0x9f0   :  { %v3010_v26 = vpop.eup %3009  ;;  %v1690_v46 = vpack.c.bf16 %v3008_v27, %v3004_v23  ;;  %v2938_v27 = vld [vmem:[%s4343_s9 + $0x80] sm:$0xff]  }
 0x9f1   :  { %v1691_v13 = vpack.c.bf16 %v3010_v26, %v3006_v20 }
 0x9f3   :  { %2469 = vmatprep.mubr.msk.bf16.mxu0 %vm4472_vm0, %v1691_v13 }
 0x9f4   :  { %1728 = vmatmul.mubr.bf16.vlgmr.msra.gmra.mrb[32].mxu0 %v1690_v46 }
 0x9f5   :  { %2590 = vmatprep.mubr.msk.bf16.mxu0 %vm3068_vm11, %v4431_v39 }
 0xac7   :  { %v1729_v9 = vpop.f32.mrb[32].mxu0 }
 0xac8   :  { %v1731_v43 = vpop.f32.mrb[33].mxu0 }
 0xac9   :  { %v1732_v24 = vpop.f32.mrb[34].mxu0  ;;  %v2940_v43 = vld [vmem:[%s4343_s9 + $0x90] sm:$0xff]  }
 0xaca   :  { %v1736_v31 = vpack.c.bf16 %v1732_v24, %v1729_v9  ;;  %v1734_v17 = vpop.f32.mrb[35].mxu0  ;;  %v2939_v9 = vld [vmem:[%s4343_s9 + $0x88] sm:$0xff]   ;;  %v2941_v24 = vld [vmem:[%s4343_s9 + $0x98] sm:$0xff]  }
 0xacb   :  { %v2943_v17 = vld [vmem:[%s4343_s9 + $0xa8] sm:$0xff]  }
 0xacc   :  { %v1738_v28 = vsel %vm116_vm2, %v1736_v31, 0  ;;  %vm1812_vm2 = vcmask 1040384   ;;  %v2942_v31 = vld [vmem:[%s4343_s9 + $0xa0] sm:$0xff]  }
 0xacd   :  { %2589 = vmatpush3.bf16.msra.mxu0 %v1738_v28  ;;  %v2944_v28 = vld [vmem:[%s4343_s9 + $0xb0] sm:$0xff]  }
 0xace   :  { %2526 = vmatprep.subr.bf16.mxu0 %v2922_v18 }
 0xad0   :  { %2591 = vmatmul.mubr.msk.bf16.vlgmr.msra.gmra.mrb[36].mxu0 %vm1186_vm15, %v3903_v21  ;;  %v2926_v21 = vld [vmem:[%s4343_s9 + $0x50] sm:$0xff]  }
 0xad1   :  { %2527 = vmatpush3.bf16.msra.mxu0 %v2923_v63  ;;  %v2945_v63 = vld [vmem:[%s4343_s9 + $0xb8] sm:$0xff]  }
 0xad2   :  { %2528 = vmatprep.subr.bf16.mxu0 %v2924_v3 }
 0xad5   :  { %2529 = vmatpush3.bf16.msra.mxu0 %v2925_v19  ;;  %v2946_v19 = vld [vmem:[%s4343_s9 + $0xc0] sm:$0xff]  }
 0xad6   :  { %2530 = vmatprep.subr.bf16.mxu0 %v2926_v21 }
 0xad9   :  { %2531 = vmatpush3.bf16.msra.mxu0 %v2927_v4 }
 0xada   :  { %2532 = vmatprep.subr.bf16.mxu0 %v2928_v55 }
 0xadd   :  { %2533 = vmatpush3.bf16.msra.mxu0 %v2929_v32  ;;  %v2947_v32 = vld [vmem:[%s4345_s11] sm:$0xff]  }
 0xade   :  { %2534 = vmatprep.subr.bf16.mxu0 %v2930_v33  ;;  %2595 = vmatpush3.bf16.msra.mxu1 %v2947_v32  ;;  %v2948_v33 = vld [vmem:[%s4345_s11 + $0x8] sm:$0xff]  }
 0xadf   :  { %2596 = vmatprep.subr.bf16.mxu1 %v4431_v39 }
 0xae1   :  { %2535 = vmatpush3.bf16.msra.mxu0 %v2931_v2  ;;  %v2950_v2 = vld [vmem:[%s4345_s11 + $0x18] sm:$0xff]  }
 0xae2   :  { %2536 = vmatprep.subr.bf16.mxu0 %v2932_v34  ;;  %2597 = vmatpush3.bf16.msra.mxu1 %v2948_v33  ;;  %v2951_v34 = vld [vmem:[%s4345_s11 + $0x20] sm:$0xff]  }
 0xae3   :  { %2598 = vmatprep.subr.bf16.mxu1 %v4431_v39 }
 0xae5   :  { %2537 = vmatpush3.bf16.msra.mxu0 %v2933_v35  ;;  %v2952_v35 = vld [vmem:[%s4345_s11 + $0x28] sm:$0xff]  }
 0xae6   :  { %2538 = vmatprep.subr.bf16.mxu0 %v2934_v38  ;;  %v2953_v38 = vld [vmem:[%s4345_s11 + $0x30] sm:$0xff]  }
 0xae9   :  { %2539 = vmatpush3.bf16.msra.mxu0 %v2935_v58  ;;  %v2954_v58 = vld [vmem:[%s4345_s11 + $0x38] sm:$0xff]  }
 0xaea   :  { %2540 = vmatprep.subr.bf16.mxu0 %v2936_v0  ;;  %v2955_v0 = vld [vmem:[%s4347_s13] sm:$0xff]  }
 0xaed   :  { %2541 = vmatpush3.bf16.msra.mxu0 %v2937_v7  ;;  %v2956_v7 = vld [vmem:[%s4347_s13 + $0x8] sm:$0xff]  }
 0xaee   :  { %2072 = vmatprep.subr.bf16.mxu0 %v4432_v45 }
 0xba3   :  { %v1774_v22 = vpop.f32.mrb[36].mxu0 }
 0xba4   :  { %v2592_v37 = vpop.f32.mrb[37].mxu0  ;;  %v1785_v49 = vrot.slane %v1774_v22, 2  ;;  %v1781_v51 = vrot.slane %v1774_v22, 1  ;;  %v1789_v60 = vrot.slane %v1774_v22, 3  ;;  %v1793_v1 = vrot.slane %v1774_v22, 4 }
 0xba5   :  { %v1777_v52 = vpop.f32.mrb[38].mxu0  ;;  %v2958_v37 = vld [vmem:[%s4347_s13 + $0x18] sm:$0xff]  }
 0xba6   :  { %v2788_v53 = vpack.i.bf16 %v1238_v48, %v1785_v49  ;;  %v2783_v40 = vpack.i.bf16 %v1234_v50, %v1781_v51  ;;  %v2593_v8 = vpop.f32.mrb[39].mxu0 }
 0xba8   :  { %2789 = vrot.lane.b32.xlu1 %v2788_v53, %s3072_s1  ;;  %2784 = vrot.lane.b32.xlu0 %v2783_v40, %s3070_s19  ;;  %v2471_v53 = vld [vmem:[%s4344_s10] ss:$0 sm:$0xff] }
 0xbac   :  { %1243 = vrot.lane.b32.xlu1 %v1242_v54, %s3065_s28  ;;  %1790 = vrot.lane.b32.xlu0 %v1789_v60, %s3065_s28 }
 0xbb0   :  { %1247 = vrot.lane.b32.xlu1 %v1246_v62, %s3073_s27  ;;  %1794 = vrot.lane.b32.xlu0 %v1793_v1, %s3073_s27 }
 0xc1a   :  { %v2790_v5 = vpop.permute.xlu1 %2789  ;;  %v2785_v6 = vpop.permute.xlu0 %2784 }
 0xc1b   :  { %v2792_v10 = vunpack.i.h.bf16 %v2790_v5  ;;  %v2791_v11 = vunpack.i.l.bf16 %v2790_v5  ;;  %v2787_v12 = vunpack.i.h.bf16 %v2785_v6  ;;  %v2786_v14 = vunpack.i.l.bf16 %v2785_v6 }
 0xc1d   :  { %v1797_v36 = vsel %vm620_vm14, %v1774_v22, %v2786_v14  ;;  %v1798_v56 = vsel %vm4473_vm1, %v2786_v14, %v2791_v11  ;;  %v1251_v57 = vsel %vm4474_vm3, %v2787_v12, %v2792_v10  ;;  %v1250_v59 = vsel %vm620_vm14, %v4025_v16, %v2787_v12  ;;  %v2957_v22 = vld [vmem:[%s4347_s13 + $0x10] sm:$0xff]   ;;  %v2959_v10 = vld [vmem:[%s4347_s13 + $0x20] sm:$0xff]   ;;  %v2960_v11 = vld [vmem:[%s4347_s13 + $0x28] sm:$0xff]  }
 0xc1e   :  { %v1804_v29 = vrot.slane %v1797_v36, 7  ;;  %v1244_v15 = vpop.permute.xlu1 %1243  ;;  %v1791_v30 = vpop.permute.xlu0 %1790  ;;  %v2961_v12 = vld [vmem:[%s4347_s13 + $0x30] sm:$0xff]   ;;  %v2962_v14 = vld [vmem:[%s4347_s13 + $0x38] sm:$0xff]   ;;  %v2498_v36 = vld [vmem:[%s4346_s12] ss:$0 sm:$0xff]  ;;  %s2345_s13 = sshll.u32 %s3074_s16, 4  ;;  %s2346_s13 = int_to_ptr.vmem [resolvable:$true] %s2345_s13 }
 0xc1f   :  { %v1799_v47 = vsel %vm171_vm8, %v1798_v56, %v1791_v30  ;;  %v1252_v44 = vsel %vm171_vm8, %v1251_v57, %v1244_v15  ;;  %s3038_s12 = scalar_lea.vmem %s2346_s13, 32  ;;  %p3043_p1 = scmp.lt.s32.totalorder %s2346_s13, %s2346_s13 }
 0xc20   :  { %v1805_v61 = vrot.slane %v1799_v47, 7  ;;  %v1813_v25 = vsel %vm1812_vm2, %v1250_v59, %v1804_v29  ;;  %p3039_p0 = scmp.ne.s32.totalorder %s2346_s13, %s3038_s12  ;;  %p3044_p2 = scmp.lt.s32.totalorder %s3038_s12, %s3038_s12 }
 0xc21   :  { %v1817_v46 = vpack.c.bf16 %v1813_v25, %v1813_v25 }
 0xc22   :  { %v1795_v41 = vpop.permute.xlu0 %1794  ;;  %v1814_v42 = vsel %vm1812_vm2, %v1252_v44, %v1805_v61  ;;  %v1248_v26 = vpop.permute.xlu1 %1247  ;;  %p3045_p3 = por %p3044_p2, %p3043_p1 }
 0xc23   :  { %v1807_v23 = vrot.slane %v1795_v41, 7  ;;  %v1818_v20 = vpack.c.bf16 %v1814_v42, %v1814_v42  ;;  %v1800_v18 = vsel %vm1253_vm5, %v1791_v30, %v1795_v41  ;;  %v1254_v21 = vsel %vm1253_vm5, %v1244_v15, %v1248_v26 }
 0xc24   :  { %v1806_v3 = vrot.slane %v1800_v18, 7  ;;  %p3046_p4 = pnand %p3045_p3, %p3039_p0 }
 0xc25   :  { %v1816_v16 = vsel %vm1812_vm2, %v1248_v26, %v1807_v23  ;;  %2064 = vmatprep.mubr.bf16.mxu0 %v1818_v20 }
 0xc26   :  { %v1820_v13 = vpack.c.bf16 %v1816_v16, %v1816_v16  ;;  %2065 = vmatmul.mubr.bf16.vlgmr.msra.gmra.mrb[40].mxu0 %v1817_v46  ;;  %v1815_v4 = vsel %vm1812_vm2, %v1254_v21, %v1806_v3 }
 0xc27   :  { %2073 = vmatpush1.bf16.msra.mxu0 %v2938_v27  ;;  %v1819_v55 = vpack.c.bf16 %v1815_v4, %v1815_v4 }
 0xc28   :  { %2497 = vmatprep.mubr.msk.bf16.mxu0 %vm2028_vm4, %v1820_v13  ;;  %2074 = vmatprep.subr.bf16.mxu0 %v4432_v45 }
 0xc2b   :  { %2075 = vmatpush1.bf16.msra.mxu0 %v2939_v9 }
 0xc2c   :  { %2076 = vmatprep.subr.bf16.mxu0 %v4432_v45 }
 0xc2f   :  { %2077 = vmatpush1.bf16.msra.mxu0 %v2940_v43 }
 0xc30   :  { %2078 = vmatprep.subr.bf16.mxu0 %v4432_v45 }
 0xc33   :  { %2079 = vmatpush1.bf16.msra.mxu0 %v2941_v24 }
 0xc34   :  { %2080 = vmatprep.subr.bf16.mxu0 %v4432_v45 }
 0xc37   :  { %2081 = vmatpush1.bf16.msra.mxu0 %v2942_v31 }
 0xc38   :  { %2082 = vmatprep.subr.bf16.mxu0 %v4432_v45 }
 0xc3b   :  { %2083 = vmatpush1.bf16.msra.mxu0 %v2943_v17 }
 0xc3c   :  { %2084 = vmatprep.subr.bf16.mxu0 %v4432_v45 }
 0xc3f   :  { %2085 = vmatpush1.bf16.msra.mxu0 %v2944_v28 }
 0xc40   :  { %2086 = vmatprep.subr.bf16.mxu0 %v4432_v45 }
 0xc43   :  { %2087 = vmatpush1.bf16.msra.mxu0 %v2945_v63 }
 0xc44   :  { %2088 = vmatprep.subr.bf16.mxu0 %v4432_v45  ;;  %v2949_v45 = vld [vmem:[%s4345_s11 + $0x10] sm:$0xff]  }
 0xc45   :  { %2599 = vmatpush3.bf16.msra.mxu1 %v2949_v45 }
 0xc46   :  { %2600 = vmatprep.subr.bf16.mxu1 %v4431_v39 }
 0xc47   :  { %2089 = vmatpush1.bf16.msra.mxu0 %v2946_v19 }
 0xc48   :  { %2614 = vmatprep.subr.bf16.mxu0 %v4431_v39 }
 0xc49   :  { %2601 = vmatpush3.bf16.msra.mxu1 %v2950_v2 }
 0xc4a   :  { %2105 = vmatmul.mubr.bf16.vlgmr.msra.gmra.mrb[44].mxu0 %v1819_v55  ;;  %2602 = vmatprep.subr.bf16.mxu1 %v4431_v39 }
 0xc4b   :  { %2630 = vmatprep.mubr.msk.bf16.mxu0 %vm3068_vm11, %v4431_v39  ;;  %2615 = vmatpush3.bf16.msra.mxu0 %v2955_v0 }
 0xc4c   :  { %2616 = vmatprep.subr.bf16.mxu0 %v4431_v39 }
 0xc4d   :  { %2603 = vmatpush3.bf16.msra.mxu1 %v2951_v34 }
 0xc4e   :  { %2604 = vmatprep.subr.bf16.mxu1 %v4431_v39 }
 0xc4f   :  { %2617 = vmatpush3.bf16.msra.mxu0 %v2956_v7 }
 0xc50   :  { %2618 = vmatprep.subr.bf16.mxu0 %v4431_v39 }
 0xc51   :  { %2605 = vmatpush3.bf16.msra.mxu1 %v2952_v35 }
 0xc52   :  { %2606 = vmatprep.subr.bf16.mxu1 %v4431_v39 }
 0xc53   :  { %2619 = vmatpush3.bf16.msra.mxu0 %v2957_v22 }
 0xc54   :  { %2620 = vmatprep.subr.bf16.mxu0 %v4431_v39 }
 0xc55   :  { %2607 = vmatpush3.bf16.msra.mxu1 %v2953_v38 }
 0xc56   :  { %2608 = vmatprep.subr.bf16.mxu1 %v4431_v39 }
 0xc57   :  { %2621 = vmatpush3.bf16.msra.mxu0 %v2958_v37 }
 0xc58   :  { %2622 = vmatprep.subr.bf16.mxu0 %v4431_v39 }
 0xc59   :  { %2609 = vmatpush3.bf16.msra.mxu1 %v2954_v58 }
 0xc5b   :  { %2623 = vmatpush3.bf16.msra.mxu0 %v2959_v10 }
 0xc5c   :  { %2624 = vmatprep.subr.bf16.mxu0 %v4431_v39 }
 0xc5f   :  { %2625 = vmatpush3.bf16.msra.mxu0 %v2960_v11 }
 0xc60   :  { %2626 = vmatprep.subr.bf16.mxu0 %v4431_v39 }
 0xc63   :  { %2627 = vmatpush3.bf16.msra.mxu0 %v2961_v12 }
 0xc64   :  { %2628 = vmatprep.subr.bf16.mxu0 %v4431_v39  ;;  %v2507_v39 = vld [vmem:[%s4348_s14] ss:$0 sm:$0xff] }
 0xc67   :  { %2629 = vmatpush3.bf16.msra.mxu0 %v2962_v14 }
 0xcf9   :  { %v2542_v48 = vpop.f32.mrb[40].mxu0 }
 0xcfa   :  { %v2543_v49 = vpop.f32.mrb[41].mxu0 }
 0xcfb   :  { %v2544_v50 = vadd.f32 %v2543_v49, %v2542_v48  ;;  %v2545_v51 = vpop.f32.mrb[42].mxu0 }
 0xcfc   :  { %v2546_v52 = vpop.f32.mrb[43].mxu0 }
 0xcfd   :  { %v2067_v40 = vadd.f32 %v2544_v50, %v2471_v53 }
 0xd1d   :  { %v2106_v8 = vpop.f32.mrb[44].mxu0 }
 0xd1e   :  { %v2107_v54 = vadd.f32 %v2106_v8, %v2067_v40  ;;  %v2108_v60 = vpop.f32.mrb[45].mxu0 }
 0xd1f   :  { %v2109_v62 = vpop.f32.mrb[46].mxu0 }
 0xd20   :  { %3011 = vtanh.f32 %v2107_v54  ;;  %v2110_v1 = vpop.f32.mrb[47].mxu0 }
 0xd2a   :  { %v3012_v5 = vpop.eup %3011 }
 0xd2b   :  { %v2113_v6 = vpack.c.bf16 %v3012_v5, %v3012_v5 }
 0xd2d   :  { %2611 = vmatmul.mubr.bf16.vlgmr.msra.gmra.mrb[24].mxu1 %v2113_v6 }
 0xe00   :  { %v2219_v56 = vpop.f32.mrb[24].mxu1 }
 0xe01   :  { %v2220_v29 = vadd.f32 %v2498_v36, %v2219_v56  ;;  %v2612_v15 = vpop.f32.mrb[25].mxu1 }
 0xe02   :  { %v2222_v57 = vpop.f32.mrb[26].mxu1 }
 0xe03   :  { %3013 = vtanh.f32 %v2220_v29  ;;  %v2613_v30 = vpop.f32.mrb[27].mxu1 }
 0xe0d   :  { %v3014_v59 = vpop.eup %3013 }
 0xe0e   :  { %v2226_v47 = vpack.c.bf16 %v3014_v59, %v3014_v59 }
 0xe10   :  { %2631 = vmatmul.mubr.bf16.vlgmr.msra.gmra.mrb[48].mxu0 %v2226_v47 }
 0xee3   :  { %v2332_v61 = vpop.f32.mrb[48].mxu0 }
 0xee4   :  { %v2333_v25 = vadd.f32 %v2507_v39, %v2332_v61  ;;  %v2632_v44 = vpop.f32.mrb[49].mxu0 }
 0xee5   :  { %v2335_v41 = vpop.f32.mrb[50].mxu0 }
 0xee6   :  { %2338 = vst [vmem:[#allocation2] sm:$0x3] %v2333_v25  ;;  %v2633_v42 = vpop.f32.mrb[51].mxu0 }
 0xee7   :  { %3049 = shalt.err (!%p3046_p4)
}
 0xee8   :  { %s3050_s14 = scalar_lea.hbm %s4349_s15, 32 }
 0xee9   :  { %p3051_p5 = scmp.ne.s32.totalorder %s4349_s15, %s3050_s14  ;;  %p3054_p6 = scmp.lt.u32.totalorder %s3050_s14, %s4349_s15 }
 0xeeb   :  { %p3056_p7 = pnand %p3054_p6, %p3051_p5 }
 0xeed   :  { %3059 = shalt.err (!%p3056_p7)
}
 0xeee   :  { %2348 = dma.vmem_to_hbm [thread:$0]  %s2346_s13, 32, %s4349_s15, [#allocation3]  }
 0xeef   :  { %3060 = dma.done.wait [#allocation3], 32  }
 0xef0   :  { %3061 = vsyncadd [#allocation3], 4294967264 }
 0xef1   :  { %2352 = vsyncpa [#allocation3], 1 }

</bundles_post_ra>
